<compile_context>
chip_gen: v7x
topology: tpu7x:2x2x1
jax: 0.10.0
libtpu: 0.0.40
codegen_flags: <defaults>
</compile_context>

<pallas_src>
import functools

import jax
import jax.numpy as jnp
from jax.experimental import pallas as pl
from jax.experimental.pallas import tpu as pltpu

C_COND = 64
C_FEAT = 128


def _sft_kernel(feat_ref, cond_ref, w0_ref, b0_ref, w1_ref, b1_ref, out_ref):
    """One (batch-block, pixel-tile) grid step.

    feat_ref: (nb, 128, tp)   cond_ref: (nb, 64, tp)
    w0_ref:   (128, 64)   b0_ref: (128, 1)   fused [scale_conv0; shift_conv0]
    w1_ref:   (256, 128)  b1_ref: (256, 1)   block-diag(scale_conv1, shift_conv1),
                                             "+1" folded into b1[:128]
    out_ref:  (nb, 128, tp)
    """
    nb = feat_ref.shape[0]
    w0 = w0_ref[...]
    b0 = b0_ref[...]
    w1 = w1_ref[...]
    b1 = b1_ref[...]
    for n in range(nb):                                # nb is static -> unrolled
        cond = cond_ref[n].astype(w0.dtype)            # (64, tp)
        # Layer 0 of both branches in one MXU dot: (128,64) @ (64,tp), f32 acc.
        h = jnp.dot(w0, cond, preferred_element_type=jnp.float32) + b0
        h = jnp.maximum(h, 0.1 * h)                    # leaky_relu(., 0.1) as one vmax
        # Layer 1 of both branches as block-diag: (256,128) @ (128,tp), f32 acc.
        ss = jnp.dot(w1, h.astype(w1.dtype), preferred_element_type=jnp.float32) + b1
        scale = ss[:C_FEAT]                            # already includes the "+1"
        shift = ss[C_FEAT:]
        out_ref[n] = (feat_ref[n] * scale + shift).astype(out_ref.dtype)


def _pack_params(params, w_dtype):
    """Pack the 8 conv params (PyTorch (out,in) weights, (out,) biases) into 4 refs."""
    ws0, bs0, ws1, bs1, wh0, bh0, wh1, bh1 = params
    w0 = jnp.concatenate([ws0, wh0], axis=0).astype(w_dtype)                   # (128, 64)
    b0 = jnp.concatenate([bs0, bh0], axis=0)[:, None].astype(jnp.float32)      # (128, 1)
    w1 = jnp.zeros((2 * C_FEAT, 2 * C_COND), w_dtype)
    w1 = w1.at[:C_FEAT, :C_COND].set(ws1.astype(w_dtype))
    w1 = w1.at[C_FEAT:, C_COND:].set(wh1.astype(w_dtype))                      # (256, 128)
    # Fold the "+1" of `feat * (scale + 1)` into the scale half of the bias.
    b1 = jnp.concatenate([bs1 + 1.0, bh1], axis=0)[:, None].astype(jnp.float32)  # (256, 1)
    return w0, b0, w1, b1


def _chip_config():
    """(pixel-tile cap, vmem_limit_bytes) per TPU generation."""
    kind = ""
    try:
        kind = jax.devices()[0].device_kind.lower()
    except Exception:  # no devices / odd backend -> conservative defaults
        pass
    if "v5e" in kind or "v5 lite" in kind or "v5lite" in kind:
        return 2048, 32 << 20          # 128 MiB physical, 16 MiB scoped default
    if "v7" in kind:
        return 4096, 44 << 20          # only 64 MiB physical VMEM per TC
    if "v6" in kind:
        return 4096, 64 << 20          # 128 MiB physical
    return 2048, None                  # unknown chip: stay within scoped default


def _largest_divisor_leq(n, k):
    k = max(1, min(n, k))
    while n % k:
        k -= 1
    return k


def _choose_tiling(N, HW, tp_cap, itemsize, *, target_bytes=2 << 20,
                   min_steps=4, min_tile_pix=512):
    """Pick (batch block nb, pixel tile) for the grid."""
    # Pixel tile: multiple of 128 lanes (lane-dense stores) or the full extent.
    tile = HW if HW <= tp_cap else tp_cap
    # Batch block: amortize the ~0.35us per-grid-step overhead when H*W is small.
    bytes_per_pixel = (2 * C_FEAT + C_COND) * itemsize          # feat in + out + cond
    target_pixels = max(1, target_bytes // bytes_per_pixel)
    nb = _largest_divisor_leq(N, max(1, target_pixels // max(tile, 1)))

    def steps():
        return pl.cdiv(N, nb) * pl.cdiv(HW, tile)

    # Keep enough grid steps to feed both v7x TensorCores / the DMA pipeline,
    # but only when there is enough total work to be worth splitting.
    if N * HW >= min_steps * min_tile_pix:
        while steps() < min_steps and nb > 1:
            nb = _largest_divisor_leq(N, nb - 1)
        while steps() < min_steps:
            cand = max(128, ((tile // 2) // 128) * 128)
            if cand >= tile or cand < min_tile_pix:
                break
            tile = cand
    return nb, tile


@functools.partial(jax.jit, static_argnames=("tp", "matmul_dtype"))
def sft_layer(feat_nchw, cond_nchw, params, *, tp=None, matmul_dtype=None):
    """feat_nchw: (N,128,H,W), cond_nchw: (N,64,H,W) -> (N,128,H,W)."""
    N, Cf, H, W = feat_nchw.shape
    Nc, Cc, Hc, Wc = cond_nchw.shape
    assert Cf == C_FEAT and Cc == C_COND and (N, H, W) == (Nc, Hc, Wc)
    HW = H * W

    # Channels on sublanes, pixels on lanes: pure reshapes, no data movement.
    feat = feat_nchw.reshape(N, C_FEAT, HW)
    cond = cond_nchw.reshape(N, C_COND, HW)

    tp_cap, vmem_limit = _chip_config()
    if tp is not None:
        tp_cap = max(128, (int(tp) // 128) * 128)   # floor user tp to a lane multiple
    nb, tile = _choose_tiling(N, HW, tp_cap, feat.dtype.itemsize)
    grid = (pl.cdiv(N, nb), pl.cdiv(HW, tile))

    w_dtype = jnp.dtype(matmul_dtype) if matmul_dtype is not None else feat.dtype
    w0, b0, w1, b1 = _pack_params(params, w_dtype)

    pix_f = pl.BlockSpec((nb, C_FEAT, tile), lambda n, p: (n, 0, p))
    pix_c = pl.BlockSpec((nb, C_COND, tile), lambda n, p: (n, 0, p))
    const = lambda shape: pl.BlockSpec(shape, lambda n, p: (0, 0))

    out = pl.pallas_call(
        _sft_kernel,
        out_shape=jax.ShapeDtypeStruct((N, C_FEAT, HW), feat.dtype),
        grid_spec=pltpu.PrefetchScalarGridSpec(
            num_scalar_prefetch=0,
            grid=grid,
            in_specs=[
                pix_f,                               # feat tile   (nb,128,tile)
                pix_c,                               # cond tile   (nb, 64,tile)
                const((2 * C_COND, C_COND)),         # w0 packed   (128,64)
                const((2 * C_COND, 1)),              # b0 packed   (128,1)
                const((2 * C_FEAT, 2 * C_COND)),     # w1 blockdiag(256,128)
                const((2 * C_FEAT, 1)),              # b1 packed   (256,1), +1 folded
            ],
            out_specs=pix_f,
        ),
        compiler_params=pltpu.CompilerParams(
            dimension_semantics=("parallel", "parallel"),
            vmem_limit_bytes=vmem_limit),
    )(feat, cond, w0, b0, w1, b1)

    return out.reshape(N, C_FEAT, H, W)


def init_params(key, dtype=jnp.float32):
    """Synthetic params in PyTorch Conv2d layout: weight (out,in) (1x1 squeezed), bias (out,)."""
    ks = jax.random.split(key, 8)

    def w(k, cout, cin):
        return (jax.random.normal(k, (cout, cin), dtype) / jnp.sqrt(cin)).astype(dtype)

    def b(k, cout):
        return (0.01 * jax.random.normal(k, (cout,), dtype)).astype(dtype)

    ws0 = w(ks[0], C_COND, C_COND); bs0 = b(ks[1], C_COND)
    ws1 = w(ks[2], C_FEAT, C_COND); bs1 = b(ks[3], C_FEAT)
    wh0 = w(ks[4], C_COND, C_COND); bh0 = b(ks[5], C_COND)
    wh1 = w(ks[6], C_FEAT, C_COND); bh1 = b(ks[7], C_FEAT)
    return (ws0, bs0, ws1, bs1, wh0, bh0, wh1, bh1)


def _reference(feat_nchw, cond_nchw, params):
    """Pure-JAX reference mirroring the PyTorch forward (NCHW, slope=0.1)."""
    ws0, bs0, ws1, bs1, wh0, bh0, wh1, bh1 = params
    hp = jax.lax.Precision.HIGHEST

    def conv1x1(x, w, b):  # x (N,Cin,H,W), w (Cout,Cin), b (Cout,)
        return jnp.einsum("oc,nchw->nohw", w, x, precision=hp) + b[None, :, None, None]

    lrelu = lambda v: jnp.where(v >= 0, v, 0.1 * v)
    scale = conv1x1(lrelu(conv1x1(cond_nchw, ws0, bs0)), ws1, bs1)
    shift = conv1x1(lrelu(conv1x1(cond_nchw, wh0, bh0)), wh1, bh1)
    return feat_nchw * (scale + 1.0) + shift


if __name__ == "__main__":
    key = jax.random.PRNGKey(0)
    k_feat, k_cond, k_par = jax.random.split(key, 3)

    N, H, W = 2, 16, 16
    feat = jax.random.normal(k_feat, (N, C_FEAT, H, W), jnp.float32)   # x[0]
    cond = jax.random.normal(k_cond, (N, C_COND, H, W), jnp.float32)   # x[1]
    params = init_params(k_par)

    ref = jax.block_until_ready(_reference(feat, cond, params))

    # Exact-semantics path (matmul operands in the input dtype, f32 here).
    out = jax.block_until_ready(sft_layer(feat, cond, params))
    assert out.shape == (N, C_FEAT, H, W)
    max_err = float(jnp.max(jnp.abs(out - ref)))
    assert jnp.allclose(out, ref, atol=1e-3, rtol=1e-3), f"max abs err {max_err}"

    # bf16-operand fast path (f32 accumulation) — sanity-check with a loose bound.
    out_bf16 = jax.block_until_ready(
        sft_layer(feat, cond, params, matmul_dtype=jnp.bfloat16))
    max_err_bf16 = float(jnp.max(jnp.abs(out_bf16 - ref)))
    assert max_err_bf16 < 0.25, f"bf16 path max abs err {max_err_bf16}"

    print("KERNEL_OK")
</pallas_src>

<mosaic_0001>
module attributes {stable_mosaic.version = 11 : i64} {
  func.func @_sft_kernel(%arg0: i32, %arg1: i32, %arg2: memref<2x128x256xf32, #tpu.memory_space<vmem>>, %arg3: memref<2x64x256xf32, #tpu.memory_space<vmem>>, %arg4: memref<128x64xf32, #tpu.memory_space<vmem>>, %arg5: memref<128x1xf32, #tpu.memory_space<vmem>>, %arg6: memref<256x128xf32, #tpu.memory_space<vmem>>, %arg7: memref<256x1xf32, #tpu.memory_space<vmem>>, %arg8: memref<2x128x256xf32, #tpu.memory_space<vmem>>) attributes {dimension_semantics = [#tpu.dimension_semantics<parallel>, #tpu.dimension_semantics<parallel>], iteration_bounds = array<i64: 1, 1>, scalar_prefetch = 0 : i64, scratch_operands = 0 : i64, tpu.core_type = #tpu.core_type<tc>, window_params = [{transform_indices = @transform_0, window_bounds = array<i64: 2, 128, 256>}, {transform_indices = @transform_1, window_bounds = array<i64: 2, 64, 256>}, {pipeline_mode = #tpu.pipeline_mode<synchronous>, transform_indices = @transform_2, window_bounds = array<i64: 128, 64>}, {pipeline_mode = #tpu.pipeline_mode<synchronous>, transform_indices = @transform_3, window_bounds = array<i64: 128, 1>}, {pipeline_mode = #tpu.pipeline_mode<synchronous>, transform_indices = @transform_4, window_bounds = array<i64: 256, 128>}, {pipeline_mode = #tpu.pipeline_mode<synchronous>, transform_indices = @transform_5, window_bounds = array<i64: 256, 1>}, {transform_indices = @transform_6, window_bounds = array<i64: 2, 128, 256>}]} {
    %c0 = arith.constant 0 : index
    %c0_0 = arith.constant 0 : index
    %0 = vector.load %arg4[%c0, %c0_0] : memref<128x64xf32, #tpu.memory_space<vmem>>, vector<128x64xf32>
    %c0_1 = arith.constant 0 : index
    %c0_2 = arith.constant 0 : index
    %1 = vector.load %arg5[%c0_1, %c0_2] : memref<128x1xf32, #tpu.memory_space<vmem>>, vector<128x1xf32>
    %c0_3 = arith.constant 0 : index
    %c0_4 = arith.constant 0 : index
    %2 = vector.load %arg6[%c0_3, %c0_4] : memref<256x128xf32, #tpu.memory_space<vmem>>, vector<256x128xf32>
    %c0_5 = arith.constant 0 : index
    %c0_6 = arith.constant 0 : index
    %3 = vector.load %arg7[%c0_5, %c0_6] : memref<256x1xf32, #tpu.memory_space<vmem>>, vector<256x1xf32>
    %c0_7 = arith.constant 0 : index
    %c0_8 = arith.constant 0 : index
    %c0_9 = arith.constant 0 : index
    %4 = vector.load %arg3[%c0_7, %c0_8, %c0_9] : memref<2x64x256xf32, #tpu.memory_space<vmem>>, vector<1x64x256xf32>
    %5 = vector.shape_cast %4 : vector<1x64x256xf32> to vector<64x256xf32>
    %cst = arith.constant dense<0.000000e+00> : vector<128x256xf32>
    %6 = tpu.matmul %0, %5, %cst {dimension_numbers = #tpu.dot_dimension_numbers<[1], [0], [0], [1], [0, 0, 1, 1], [], []>} : vector<128x64xf32>, vector<64x256xf32>, vector<128x256xf32> -> vector<128x256xf32>
    %7 = vector.broadcast %1 : vector<128x1xf32> to vector<128x256xf32>
    %8 = arith.addf %6, %7 : vector<128x256xf32>
    %cst_10 = arith.constant 1.000000e-01 : f32
    %9 = vector.broadcast %cst_10 : f32 to vector<128x256xf32>
    %10 = arith.mulf %9, %8 : vector<128x256xf32>
    %11 = arith.maximumf %8, %10 : vector<128x256xf32>
    %cst_11 = arith.constant dense<0.000000e+00> : vector<256x256xf32>
    %12 = tpu.matmul %2, %11, %cst_11 {dimension_numbers = #tpu.dot_dimension_numbers<[1], [0], [0], [1], [0, 0, 1, 1], [], []>} : vector<256x128xf32>, vector<128x256xf32>, vector<256x256xf32> -> vector<256x256xf32>
    %13 = vector.broadcast %3 : vector<256x1xf32> to vector<256x256xf32>
    %14 = arith.addf %12, %13 : vector<256x256xf32>
    %15 = vector.extract_strided_slice %14 {offsets = [0, 0], sizes = [128, 256], strides = [1, 1]} : vector<256x256xf32> to vector<128x256xf32>
    %16 = vector.extract_strided_slice %14 {offsets = [128, 0], sizes = [128, 256], strides = [1, 1]} : vector<256x256xf32> to vector<128x256xf32>
    %c0_12 = arith.constant 0 : index
    %c0_13 = arith.constant 0 : index
    %c0_14 = arith.constant 0 : index
    %17 = vector.load %arg2[%c0_12, %c0_13, %c0_14] : memref<2x128x256xf32, #tpu.memory_space<vmem>>, vector<1x128x256xf32>
    %18 = vector.shape_cast %17 : vector<1x128x256xf32> to vector<128x256xf32>
    %19 = arith.mulf %18, %15 : vector<128x256xf32>
    %20 = arith.addf %19, %16 : vector<128x256xf32>
    %c0_15 = arith.constant 0 : index
    %c0_16 = arith.constant 0 : index
    %c0_17 = arith.constant 0 : index
    %21 = vector.load %arg8[%c0_15, %c0_16, %c0_17] : memref<2x128x256xf32, #tpu.memory_space<vmem>>, vector<1x128x256xf32>
    %22 = vector.shape_cast %21 : vector<1x128x256xf32> to vector<128x256xf32>
    %23 = vector.shape_cast %20 : vector<128x256xf32> to vector<1x128x256xf32>
    tpu.vector_store %arg8[%c0_15, %c0_16, %c0_17], %23 {strides = array<i32>} : memref<2x128x256xf32, #tpu.memory_space<vmem>>, vector<1x128x256xf32>,
    %c1 = arith.constant 1 : index
    %c0_18 = arith.constant 0 : index
    %c0_19 = arith.constant 0 : index
    %24 = vector.load %arg3[%c1, %c0_18, %c0_19] : memref<2x64x256xf32, #tpu.memory_space<vmem>>, vector<1x64x256xf32>
    %25 = vector.shape_cast %24 : vector<1x64x256xf32> to vector<64x256xf32>
    %cst_20 = arith.constant dense<0.000000e+00> : vector<128x256xf32>
    %26 = tpu.matmul %0, %25, %cst_20 {dimension_numbers = #tpu.dot_dimension_numbers<[1], [0], [0], [1], [0, 0, 1, 1], [], []>} : vector<128x64xf32>, vector<64x256xf32>, vector<128x256xf32> -> vector<128x256xf32>
    %27 = vector.broadcast %1 : vector<128x1xf32> to vector<128x256xf32>
    %28 = arith.addf %26, %27 : vector<128x256xf32>
    %cst_21 = arith.constant 1.000000e-01 : f32
    %29 = vector.broadcast %cst_21 : f32 to vector<128x256xf32>
    %30 = arith.mulf %29, %28 : vector<128x256xf32>
    %31 = arith.maximumf %28, %30 : vector<128x256xf32>
    %cst_22 = arith.constant dense<0.000000e+00> : vector<256x256xf32>
    %32 = tpu.matmul %2, %31, %cst_22 {dimension_numbers = #tpu.dot_dimension_numbers<[1], [0], [0], [1], [0, 0, 1, 1], [], []>} : vector<256x128xf32>, vector<128x256xf32>, vector<256x256xf32> -> vector<256x256xf32>
    %33 = vector.broadcast %3 : vector<256x1xf32> to vector<256x256xf32>
    %34 = arith.addf %32, %33 : vector<256x256xf32>
    %35 = vector.extract_strided_slice %34 {offsets = [0, 0], sizes = [128, 256], strides = [1, 1]} : vector<256x256xf32> to vector<128x256xf32>
    %36 = vector.extract_strided_slice %34 {offsets = [128, 0], sizes = [128, 256], strides = [1, 1]} : vector<256x256xf32> to vector<128x256xf32>
    %c1_23 = arith.constant 1 : index
    %c0_24 = arith.constant 0 : index
    %c0_25 = arith.constant 0 : index
    %37 = vector.load %arg2[%c1_23, %c0_24, %c0_25] : memref<2x128x256xf32, #tpu.memory_space<vmem>>, vector<1x128x256xf32>
    %38 = vector.shape_cast %37 : vector<1x128x256xf32> to vector<128x256xf32>
    %39 = arith.mulf %38, %35 : vector<128x256xf32>
    %40 = arith.addf %39, %36 : vector<128x256xf32>
    %c1_26 = arith.constant 1 : index
    %c0_27 = arith.constant 0 : index
    %c0_28 = arith.constant 0 : index
    %41 = vector.load %arg8[%c1_26, %c0_27, %c0_28] : memref<2x128x256xf32, #tpu.memory_space<vmem>>, vector<1x128x256xf32>
    %42 = vector.shape_cast %41 : vector<1x128x256xf32> to vector<128x256xf32>
    %43 = vector.shape_cast %40 : vector<128x256xf32> to vector<1x128x256xf32>
    tpu.vector_store %arg8[%c1_26, %c0_27, %c0_28], %43 {strides = array<i32>} : memref<2x128x256xf32, #tpu.memory_space<vmem>>, vector<1x128x256xf32>,
    return
  }
  func.func @transform_0(%arg0: i32, %arg1: i32) -> (i32, i32, i32) {
    %c0_i32 = arith.constant 0 : i32
    %c0_i32_0 = arith.constant 0 : i32
    return %arg0, %c0_i32, %arg1 : i32, i32, i32
  }
  func.func @transform_1(%arg0: i32, %arg1: i32) -> (i32, i32, i32) {
    %c0_i32 = arith.constant 0 : i32
    %c0_i32_0 = arith.constant 0 : i32
    return %arg0, %c0_i32, %arg1 : i32, i32, i32
  }
  func.func @transform_2(%arg0: i32, %arg1: i32) -> (i32, i32) {
    %c0_i32 = arith.constant 0 : i32
    %c0_i32_0 = arith.constant 0 : i32
    %c0_i32_1 = arith.constant 0 : i32
    return %c0_i32, %c0_i32_0 : i32, i32
  }
  func.func @transform_3(%arg0: i32, %arg1: i32) -> (i32, i32) {
    %c0_i32 = arith.constant 0 : i32
    %c0_i32_0 = arith.constant 0 : i32
    %c0_i32_1 = arith.constant 0 : i32
    return %c0_i32, %c0_i32_0 : i32, i32
  }
  func.func @transform_4(%arg0: i32, %arg1: i32) -> (i32, i32) {
    %c0_i32 = arith.constant 0 : i32
    %c0_i32_0 = arith.constant 0 : i32
    %c0_i32_1 = arith.constant 0 : i32
    return %c0_i32, %c0_i32_0 : i32, i32
  }
  func.func @transform_5(%arg0: i32, %arg1: i32) -> (i32, i32) {
    %c0_i32 = arith.constant 0 : i32
    %c0_i32_0 = arith.constant 0 : i32
    %c0_i32_1 = arith.constant 0 : i32
    return %c0_i32, %c0_i32_0 : i32, i32
  }
  func.func @transform_6(%arg0: i32, %arg1: i32) -> (i32, i32, i32) {
    %c0_i32 = arith.constant 0 : i32
    %c0_i32_0 = arith.constant 0 : i32
    return %arg0, %c0_i32, %arg1 : i32, i32, i32
  }
}

</mosaic_0001>

<bundles_post_ra>
// kernel: sft_layer.1
= control target key start
LH: loop header
LB: loop body
LE: loop exit
PB: predicated region body
PF: predicated region fallthrough
CT: control target
= control target key end

     0   :  { %v1879_v3 = vmov 0   ;;  %v1880_v4 = vmov 0.0   ;;  %vm215_vm0 = vcmask 523264   ;;  %s3100_s1 = inlined_call_operand.vmem [shape: f32[2,64,256], index: 1, kind: input, shape index: {}]   ;;  %s3101_s3 = inlined_call_operand.vmem [shape: f32[128,1], index: 3, kind: input, shape index: {}]   ;;  %s3102_s2 = inlined_call_operand.vmem [shape: f32[128,64], index: 2, kind: input, shape index: {}]   ;;  %s3103_s5 = inlined_call_operand.vmem [shape: f32[256,1], index: 5, kind: input, shape index: {}]   ;;  %s3104_s4 = inlined_call_operand.vmem [shape: f32[256,128], index: 4, kind: input, shape index: {}]   ;;  %s3105_s0 = inlined_call_operand.vmem [shape: f32[2,128,256], index: 0, kind: input, shape index: {}]   ;;  %s3106_s6 = inlined_call_operand.vmem [shape: f32[2,128,256], index: 6, kind: output, shape index: {}]  }
   0x1   :  { %v120_v0 = vld [vmem:[%s3100_s1 + $0x8] sm:$0xff]  ;;  %v122_v1 = vld [vmem:[%s3100_s1 + $0x18] sm:$0xff]  ;;  %1877 = vset.pattern.permute.xlu0 %v1879_v3  ;;  %328 = vmatprep.mubr.f32.mxu1 %v1880_v4  ;;  %v119_v7 = vld [vmem:[%s3100_s1] sm:$0xff] }
   0x2   :  { %v1684_v2 = vld [vmem:[%s3100_s1 + $0x88] sm:$0xff]  ;;  %v1779_v5 = vpack.c.bf16 %v122_v1, %v120_v0  ;;  %v1686_v6 = vld [vmem:[%s3100_s1 + $0x98] sm:$0xff]  ;;  %v121_v8 = vld [vmem:[%s3100_s1 + $0x10] sm:$0xff]  ;;  %1115 = vmatprep.mubr.f32.mxu0 %v1880_v4  ;;  %1878 = vset.pattern.permute.xlu1 %v1879_v3 }
   0x3   :  { %v1827_v9 = vpack.c.bf16 %v1686_v6, %v1684_v2  ;;  %v1781_v10 = vpack.c.bf16 %v121_v8, %v119_v7  ;;  %v1683_v11 = vld [vmem:[%s3100_s1 + $0x80] sm:$0xff]  ;;  %v1685_v12 = vld [vmem:[%s3100_s1 + $0x90] sm:$0xff]  ;;  %v124_v13 = vld [vmem:[%s3100_s1 + $0x28] sm:$0xff] }
   0x4   :  { %1780 = vmatprep.subr.bf16.mxu1 %v1779_v5  ;;  %v1829_v14 = vpack.c.bf16 %v1685_v12, %v1683_v11  ;;  %v126_v15 = vld [vmem:[%s3100_s1 + $0x38] sm:$0xff]  ;;  %v1688_v16 = vld [vmem:[%s3100_s1 + $0xa8] sm:$0xff]  ;;  %v123_v20 = vld [vmem:[%s3100_s1 + $0x20] sm:$0xff] }
   0x5   :  { %v1690_v17 = vld [vmem:[%s3100_s1 + $0xb8] sm:$0xff]  ;;  %1828 = vmatprep.subr.bf16.mxu0 %v1827_v9  ;;  %1782 = vmatpush1.bf16.msra.mxu1 %v1781_v10  ;;  %v1783_v18 = vpack.c.bf16 %v126_v15, %v124_v13  ;;  %v125_v21 = vld [vmem:[%s3100_s1 + $0x30] sm:$0xff]  ;;  %v1687_v22 = vld [vmem:[%s3100_s1 + $0xa0] sm:$0xff] }
   0x6   :  { %v1831_v19 = vpack.c.bf16 %v1690_v17, %v1688_v16  ;;  %1830 = vmatpush1.bf16.msra.mxu0 %v1829_v14  ;;  %v1785_v23 = vpack.c.bf16 %v125_v21, %v123_v20  ;;  %v1689_v24 = vld [vmem:[%s3100_s1 + $0xb0] sm:$0xff]  ;;  %v128_v25 = vld [vmem:[%s3100_s1 + $0x48] sm:$0xff]  ;;  %v130_v26 = vld [vmem:[%s3100_s1 + $0x58] sm:$0xff] }
   0x7   :  { %1784 = vmatprep.subr.bf16.mxu1 %v1783_v18  ;;  %v1833_v27 = vpack.c.bf16 %v1689_v24, %v1687_v22  ;;  %v1787_v28 = vpack.c.bf16 %v130_v26, %v128_v25  ;;  %v1692_v29 = vld [vmem:[%s3100_s1 + $0xc8] sm:$0xff]  ;;  %v1694_v30 = vld [vmem:[%s3100_s1 + $0xd8] sm:$0xff]  ;;  %v39_v31 = vld [vmem:[%s3101_s3] sm:$0xff] }
   0x8   :  { %1832 = vmatprep.subr.bf16.mxu0 %v1831_v19  ;;  %v1835_v32 = vpack.c.bf16 %v1694_v30, %v1692_v29  ;;  %137 = vperm.xlu0 %1877, %v39_v31   ;;  %v127_v33 = vld [vmem:[%s3100_s1 + $0x40] sm:$0xff]  ;;  %v129_v34 = vld [vmem:[%s3100_s1 + $0x50] sm:$0xff]  ;;  %v132_v38 = vld [vmem:[%s3100_s1 + $0x68] sm:$0xff] }
   0x9   :  { %v1691_v35 = vld [vmem:[%s3100_s1 + $0xc0] sm:$0xff]  ;;  %1786 = vmatpush1.bf16.msra.mxu1 %v1785_v23  ;;  %v1789_v36 = vpack.c.bf16 %v129_v34, %v127_v33  ;;  %v1693_v37 = vld [vmem:[%s3100_s1 + $0xd0] sm:$0xff]  ;;  %v134_v39 = vld [vmem:[%s3100_s1 + $0x78] sm:$0xff] }
   0xa   :  { %1834 = vmatpush1.bf16.msra.mxu0 %v1833_v27  ;;  %1788 = vmatprep.subr.bf16.mxu1 %v1787_v28  ;;  %v1837_v40 = vpack.c.bf16 %v1693_v37, %v1691_v35  ;;  %v1791_v41 = vpack.c.bf16 %v134_v39, %v132_v38  ;;  %v1696_v42 = vld [vmem:[%s3100_s1 + $0xe8] sm:$0xff]  ;;  %v1698_v43 = vld [vmem:[%s3100_s1 + $0xf8] sm:$0xff]  ;;  %v131_v46 = vld [vmem:[%s3100_s1 + $0x60] sm:$0xff] }
   0xb   :  { %v40_v44 = vld [vmem:[%s3101_s3 + $0x8] sm:$0xff]  ;;  %1836 = vmatprep.subr.bf16.mxu0 %v1835_v32  ;;  %v1839_v45 = vpack.c.bf16 %v1698_v43, %v1696_v42  ;;  %v133_v47 = vld [vmem:[%s3100_s1 + $0x70] sm:$0xff]  ;;  %v1695_v48 = vld [vmem:[%s3100_s1 + $0xe0] sm:$0xff] }
   0xc   :  { %142 = vperm.xlu0 %1877, %v40_v44   ;;  %v1697_v49 = vld [vmem:[%s3100_s1 + $0xf0] sm:$0xff]  ;;  %v1793_v51 = vpack.c.bf16 %v133_v47, %v131_v46  ;;  %v43_v52 = vld [vmem:[%s3101_s3 + $0x20] sm:$0xff]  ;;  %v42_v54 = vld [vmem:[%s3101_s3 + $0x18] sm:$0xff] }
   0xd   :  { %v41_v50 = vld [vmem:[%s3101_s3 + $0x10] sm:$0xff]  ;;  %1790 = vmatpush1.bf16.msra.mxu1 %v1789_v36  ;;  %v1841_v53 = vpack.c.bf16 %v1697_v49, %v1695_v48  ;;  %v23_v55 = vld [vmem:[%s3102_s2] sm:$0xff]  ;;  %v44_v57 = vld [vmem:[%s3101_s3 + $0x28] sm:$0xff] }
   0xe   :  { %147 = vperm.xlu1 %1878, %v41_v50   ;;  %1838 = vmatpush1.bf16.msra.mxu0 %v1837_v40  ;;  %v45_v56 = vld [vmem:[%s3101_s3 + $0x30] sm:$0xff]  ;;  %v24_v58 = vld [vmem:[%s3102_s2 + $0x8] sm:$0xff]  ;;  %v47_v59 = vld [vmem:[%s3101_s3 + $0x40] sm:$0xff] }
   0xf   :  { %1792 = vmatprep.subr.bf16.mxu1 %v1791_v41  ;;  %1840 = vmatprep.subr.bf16.mxu0 %v1839_v45  ;;  %v46_v60 = vld [vmem:[%s3101_s3 + $0x38] sm:$0xff]  ;;  %v25_v61 = vld [vmem:[%s3102_s2 + $0x10] sm:$0xff]  ;;  %v48_v63 = vld [vmem:[%s3101_s3 + $0x48] sm:$0xff] }
  0x10   :  { %157 = vperm.xlu0 %1877, %v43_v52   ;;  %v49_v62 = vld [vmem:[%s3101_s3 + $0x50] sm:$0xff]  ;;  %v26_v0 = vld [vmem:[%s3102_s2 + $0x18] sm:$0xff]  ;;  %v51_v1 = vld [vmem:[%s3101_s3 + $0x60] sm:$0xff] }
  0x11   :  { %1794 = vmatpush1.bf16.msra.mxu1 %v1793_v51  ;;  %v50_v2 = vld [vmem:[%s3101_s3 + $0x58] sm:$0xff]  ;;  %v27_v3 = vld [vmem:[%s3102_s2 + $0x20] sm:$0xff]  ;;  %v53_v5 = vld [vmem:[%s3101_s3 + $0x70] sm:$0xff] }
  0x12   :  { %152 = vperm.xlu1 %1878, %v42_v54   ;;  %1842 = vmatpush1.bf16.msra.mxu0 %v1841_v53  ;;  %v52_v6 = vld [vmem:[%s3101_s3 + $0x68] sm:$0xff]  ;;  %v87_v8 = vld [vmem:[%s3103_s5] sm:$0xff]  ;;  %v54_v9 = vld [vmem:[%s3101_s3 + $0x78] sm:$0xff] }
  0x13   :  { %v28_v7 = vld [vmem:[%s3102_s2 + $0x28] sm:$0xff]  ;;  %v29_v10 = vld [vmem:[%s3102_s2 + $0x30] sm:$0xff]  ;;  %v30_v13 = vld [vmem:[%s3102_s2 + $0x38] sm:$0xff] }
  0x14   :  { %1667 = vmatmul.mubr.msk.f32.vlgmr.msra.gmra.mrb[0].mxu1 %vm215_vm0, %v23_v55  ;;  %167 = vperm.xlu0 %1877, %v45_v56   ;;  %v89_v11 = vld [vmem:[%s3103_s5 + $0x10] sm:$0xff]  ;;  %v88_v12 = vld [vmem:[%s3103_s5 + $0x8] sm:$0xff]  ;;  %v91_v14 = vld [vmem:[%s3103_s5 + $0x20] sm:$0xff] }
  0x15   :  { %1699 = vmatmul.mubr.msk.f32.vlgmr.msra.gmra.mrb[0].mxu0 %vm215_vm0, %v23_v55  ;;  %334 = vmatprep.mubr.f32.mxu1 %v1880_v4  ;;  %v90_v15 = vld [vmem:[%s3103_s5 + $0x18] sm:$0xff]  ;;  %v31_v16 = vld [vmem:[%s3102_s2 + $0x40] sm:$0xff]  ;;  %v93_v17 = vld [vmem:[%s3103_s5 + $0x30] sm:$0xff] }
  0x16   :  { %1121 = vmatprep.mubr.f32.mxu0 %v1880_v4  ;;  %162 = vperm.xlu1 %1878, %v44_v57   ;;  %v92_v18 = vld [vmem:[%s3103_s5 + $0x28] sm:$0xff]  ;;  %v95_v20 = vld [vmem:[%s3103_s5 + $0x40] sm:$0xff]  ;;  %v94_v21 = vld [vmem:[%s3103_s5 + $0x38] sm:$0xff] }
  0x17   :  { %v32_v19 = vld [vmem:[%s3102_s2 + $0x48] sm:$0xff]  ;;  %v33_v22 = vld [vmem:[%s3102_s2 + $0x50] sm:$0xff]  ;;  %v34_v25 = vld [vmem:[%s3102_s2 + $0x58] sm:$0xff] }
  0x18   :  { %1668 = vmatmul.mubr.msk.f32.gmra.mrb[2].mxu1 %vm215_vm0, %v24_v58  ;;  %177 = vperm.xlu0 %1877, %v47_v59   ;;  %v97_v23 = vld [vmem:[%s3103_s5 + $0x50] sm:$0xff]  ;;  %v96_v24 = vld [vmem:[%s3103_s5 + $0x48] sm:$0xff]  ;;  %v99_v26 = vld [vmem:[%s3103_s5 + $0x60] sm:$0xff] }
  0x19   :  { %1700 = vmatmul.mubr.msk.f32.gmra.mrb[2].mxu0 %vm215_vm0, %v24_v58  ;;  %340 = vmatprep.mubr.f32.mxu1 %v1880_v4  ;;  %v98_v27 = vld [vmem:[%s3103_s5 + $0x58] sm:$0xff]  ;;  %v35_v28 = vld [vmem:[%s3102_s2 + $0x60] sm:$0xff]  ;;  %v101_v29 = vld [vmem:[%s3103_s5 + $0x70] sm:$0xff] }
  0x1a   :  { %1127 = vmatprep.mubr.f32.mxu0 %v1880_v4  ;;  %172 = vperm.xlu1 %1878, %v46_v60   ;;  %v100_v30 = vld [vmem:[%s3103_s5 + $0x68] sm:$0xff]  ;;  %v103_v32 = vld [vmem:[%s3103_s5 + $0x80] sm:$0xff]  ;;  %v102_v33 = vld [vmem:[%s3103_s5 + $0x78] sm:$0xff] }
  0x1b   :  { %v36_v31 = vld [vmem:[%s3102_s2 + $0x68] sm:$0xff]  ;;  %v37_v34 = vld [vmem:[%s3102_s2 + $0x70] sm:$0xff]  ;;  %v38_v37 = vld [vmem:[%s3102_s2 + $0x78] sm:$0xff] }
  0x1c   :  { %1669 = vmatmul.mubr.msk.f32.gmra.mrb[4].mxu1 %vm215_vm0, %v25_v61  ;;  %187 = vperm.xlu0 %1877, %v49_v62   ;;  %v105_v35 = vld [vmem:[%s3103_s5 + $0x90] sm:$0xff]  ;;  %v104_v36 = vld [vmem:[%s3103_s5 + $0x88] sm:$0xff]  ;;  %v107_v38 = vld [vmem:[%s3103_s5 + $0xa0] sm:$0xff] }
  0x1d   :  { %1701 = vmatmul.mubr.msk.f32.gmra.mrb[4].mxu0 %vm215_vm0, %v25_v61  ;;  %346 = vmatprep.mubr.f32.mxu1 %v1880_v4  ;;  %v106_v39 = vld [vmem:[%s3103_s5 + $0x98] sm:$0xff]  ;;  %v109_v40 = vld [vmem:[%s3103_s5 + $0xb0] sm:$0xff]  ;;  %v108_v41 = vld [vmem:[%s3103_s5 + $0xa8] sm:$0xff] }
  0x1e   :  { %1133 = vmatprep.mubr.f32.mxu0 %v1880_v4  ;;  %182 = vperm.xlu1 %1878, %v48_v63   ;;  %v111_v42 = vld [vmem:[%s3103_s5 + $0xc0] sm:$0xff]  ;;  %v110_v43 = vld [vmem:[%s3103_s5 + $0xb8] sm:$0xff]  ;;  %v113_v44 = vld [vmem:[%s3103_s5 + $0xd0] sm:$0xff] }
  0x1f   :  { %v112_v45 = vld [vmem:[%s3103_s5 + $0xc8] sm:$0xff]  ;;  %v115_v46 = vld [vmem:[%s3103_s5 + $0xe0] sm:$0xff]  ;;  %v114_v47 = vld [vmem:[%s3103_s5 + $0xd8] sm:$0xff] }
  0x20   :  { %1670 = vmatmul.mubr.msk.f32.gmra.mrb[6].mxu1 %vm215_vm0, %v26_v0  ;;  %197 = vperm.xlu0 %1877, %v51_v1   ;;  %v117_v48 = vld [vmem:[%s3103_s5 + $0xf0] sm:$0xff]  ;;  %v116_v49 = vld [vmem:[%s3103_s5 + $0xe8] sm:$0xff]  ;;  %v118_v50 = vld [vmem:[%s3103_s5 + $0xf8] sm:$0xff] }
  0x21   :  { %1702 = vmatmul.mubr.msk.f32.gmra.mrb[6].mxu0 %vm215_vm0, %v26_v0  ;;  %352 = vmatprep.mubr.f32.mxu1 %v1880_v4 }
  0x22   :  { %1139 = vmatprep.mubr.f32.mxu0 %v1880_v4  ;;  %192 = vperm.xlu1 %1878, %v50_v2  }
  0x24   :  { %1671 = vmatmul.mubr.msk.f32.gmra.mrb[8].mxu1 %vm215_vm0, %v27_v3  ;;  %207 = vperm.xlu0 %1877, %v53_v5  }
  0x25   :  { %1703 = vmatmul.mubr.msk.f32.gmra.mrb[8].mxu0 %vm215_vm0, %v27_v3  ;;  %358 = vmatprep.mubr.f32.mxu1 %v1880_v4 }
  0x26   :  { %1145 = vmatprep.mubr.f32.mxu0 %v1880_v4  ;;  %202 = vperm.xlu1 %1878, %v52_v6  }
  0x28   :  { %1672 = vmatmul.mubr.msk.f32.gmra.mrb[10].mxu1 %vm215_vm0, %v28_v7  ;;  %491 = vperm.xlu0 %1877, %v87_v8  }
  0x29   :  { %1704 = vmatmul.mubr.msk.f32.gmra.mrb[10].mxu0 %vm215_vm0, %v28_v7  ;;  %364 = vmatprep.mubr.f32.mxu1 %v1880_v4 }
  0x2a   :  { %1151 = vmatprep.mubr.f32.mxu0 %v1880_v4  ;;  %212 = vperm.xlu1 %1878, %v54_v9  }
  0x2c   :  { %1673 = vmatmul.mubr.msk.f32.gmra.mrb[12].mxu1 %vm215_vm0, %v29_v10  ;;  %501 = vperm.xlu0 %1877, %v89_v11  }
  0x2d   :  { %1705 = vmatmul.mubr.msk.f32.gmra.mrb[12].mxu0 %vm215_vm0, %v29_v10  ;;  %370 = vmatprep.mubr.f32.mxu1 %v1880_v4 }
  0x2e   :  { %1157 = vmatprep.mubr.f32.mxu0 %v1880_v4  ;;  %496 = vperm.xlu1 %1878, %v88_v12  }
  0x30   :  { %1674 = vmatmul.mubr.msk.f32.gmra.mrb[14].mxu1 %vm215_vm0, %v30_v13  ;;  %511 = vperm.xlu0 %1877, %v91_v14  }
  0x31   :  { %1706 = vmatmul.mubr.msk.f32.gmra.mrb[14].mxu0 %vm215_vm0, %v30_v13  ;;  %376 = vmatprep.mubr.f32.mxu1 %v1880_v4 }
  0x32   :  { %1163 = vmatprep.mubr.f32.mxu0 %v1880_v4  ;;  %506 = vperm.xlu1 %1878, %v90_v15  }
  0x34   :  { %1675 = vmatmul.mubr.msk.f32.gmra.mrb[16].mxu1 %vm215_vm0, %v31_v16  ;;  %521 = vperm.xlu0 %1877, %v93_v17  }
  0x35   :  { %1707 = vmatmul.mubr.msk.f32.gmra.mrb[16].mxu0 %vm215_vm0, %v31_v16  ;;  %382 = vmatprep.mubr.f32.mxu1 %v1880_v4 }
  0x36   :  { %1169 = vmatprep.mubr.f32.mxu0 %v1880_v4  ;;  %516 = vperm.xlu1 %1878, %v92_v18  }
  0x38   :  { %1676 = vmatmul.mubr.msk.f32.gmra.mrb[18].mxu1 %vm215_vm0, %v32_v19  ;;  %531 = vperm.xlu0 %1877, %v95_v20  }
  0x39   :  { %1708 = vmatmul.mubr.msk.f32.gmra.mrb[18].mxu0 %vm215_vm0, %v32_v19  ;;  %388 = vmatprep.mubr.f32.mxu1 %v1880_v4 }
  0x3a   :  { %1175 = vmatprep.mubr.f32.mxu0 %v1880_v4  ;;  %526 = vperm.xlu1 %1878, %v94_v21  }
  0x3c   :  { %1677 = vmatmul.mubr.msk.f32.gmra.mrb[20].mxu1 %vm215_vm0, %v33_v22  ;;  %541 = vperm.xlu0 %1877, %v97_v23  }
  0x3d   :  { %1709 = vmatmul.mubr.msk.f32.gmra.mrb[20].mxu0 %vm215_vm0, %v33_v22  ;;  %394 = vmatprep.mubr.f32.mxu1 %v1880_v4 }
  0x3e   :  { %1181 = vmatprep.mubr.f32.mxu0 %v1880_v4  ;;  %536 = vperm.xlu1 %1878, %v96_v24  }
  0x40   :  { %1678 = vmatmul.mubr.msk.f32.gmra.mrb[22].mxu1 %vm215_vm0, %v34_v25  ;;  %551 = vperm.xlu0 %1877, %v99_v26  }
  0x41   :  { %1710 = vmatmul.mubr.msk.f32.gmra.mrb[22].mxu0 %vm215_vm0, %v34_v25  ;;  %400 = vmatprep.mubr.f32.mxu1 %v1880_v4 }
  0x42   :  { %1187 = vmatprep.mubr.f32.mxu0 %v1880_v4  ;;  %546 = vperm.xlu1 %1878, %v98_v27  }
  0x44   :  { %1679 = vmatmul.mubr.msk.f32.gmra.mrb[24].mxu1 %vm215_vm0, %v35_v28  ;;  %561 = vperm.xlu0 %1877, %v101_v29  }
  0x45   :  { %1711 = vmatmul.mubr.msk.f32.gmra.mrb[24].mxu0 %vm215_vm0, %v35_v28  ;;  %406 = vmatprep.mubr.f32.mxu1 %v1880_v4 }
  0x46   :  { %1193 = vmatprep.mubr.f32.mxu0 %v1880_v4  ;;  %556 = vperm.xlu1 %1878, %v100_v30  }
  0x48   :  { %1680 = vmatmul.mubr.msk.f32.gmra.mrb[26].mxu1 %vm215_vm0, %v36_v31  ;;  %571 = vperm.xlu0 %1877, %v103_v32  }
  0x49   :  { %1712 = vmatmul.mubr.msk.f32.gmra.mrb[26].mxu0 %vm215_vm0, %v36_v31  ;;  %412 = vmatprep.mubr.f32.mxu1 %v1880_v4 }
  0x4a   :  { %1199 = vmatprep.mubr.f32.mxu0 %v1880_v4  ;;  %566 = vperm.xlu1 %1878, %v102_v33  }
  0x4c   :  { %1681 = vmatmul.mubr.msk.f32.gmra.mrb[28].mxu1 %vm215_vm0, %v37_v34  ;;  %581 = vperm.xlu0 %1877, %v105_v35  }
  0x4d   :  { %1713 = vmatmul.mubr.msk.f32.gmra.mrb[28].mxu0 %vm215_vm0, %v37_v34  ;;  %418 = vmatprep.mubr.f32.mxu1 %v1880_v4 }
  0x4e   :  { %1205 = vmatprep.mubr.f32.mxu0 %v1880_v4  ;;  %576 = vperm.xlu1 %1878, %v104_v36  }
  0x50   :  { %1682 = vmatmul.mubr.msk.f32.gmra.mrb[30].mxu1 %vm215_vm0, %v38_v37  ;;  %591 = vperm.xlu0 %1877, %v107_v38  }
  0x51   :  { %1714 = vmatmul.mubr.msk.f32.gmra.mrb[30].mxu0 %vm215_vm0, %v38_v37  ;;  %713 = vmatprep.mubr.f32.mxu1 %v1880_v4 }
  0x52   :  { %586 = vperm.xlu1 %1878, %v106_v39   ;;  %1340 = vmatprep.mubr.f32.mxu0 %v1880_v4 }
  0x54   :  { %601 = vperm.xlu0 %1877, %v109_v40  }
  0x56   :  { %596 = vperm.xlu1 %1878, %v108_v41  }
  0x58   :  { %611 = vperm.xlu0 %1877, %v111_v42  }
  0x5a   :  { %606 = vperm.xlu1 %1878, %v110_v43  }
  0x5c   :  { %621 = vperm.xlu0 %1877, %v113_v44  }
  0x5e   :  { %616 = vperm.xlu1 %1878, %v112_v45  }
  0x60   :  { %631 = vperm.xlu0 %1877, %v115_v46  }
  0x62   :  { %626 = vperm.xlu1 %1878, %v114_v47  }
  0x64   :  { %641 = vperm.xlu0 %1877, %v117_v48  }
  0x66   :  { %636 = vperm.xlu1 %1878, %v116_v49  }
  0x6a   :  { %646 = vperm.xlu1 %1878, %v118_v50  }
  0x87   :  { %v138_v51 = vpop.permute.xlu0 %137 }
  0x8b   :  { %v143_v60 = vpop.permute.xlu0 %142 }
  0x8d   :  { %v148_v5 = vpop.permute.xlu1 %147 }
  0x8f   :  { %v158_v49 = vpop.permute.xlu0 %157 }
  0x91   :  { %v153_v32 = vpop.permute.xlu1 %152 }
  0xe7   :  { %v330_v52 = vpop.f32.mrb[0].mxu1 }
  0xe8   :  { %v331_v53 = vadd.f32 %v330_v52, %v138_v51  ;;  %v1117_v54 = vpop.f32.mrb[0].mxu0  ;;  %v332_v55 = vpop.f32.mrb[1].mxu1 }
  0xe9   :  { %v1118_v56 = vadd.f32 %v1117_v54, %v138_v51  ;;  %v333_v57 = vadd.f32 %v332_v55, %v138_v51  ;;  %v1119_v58 = vpop.f32.mrb[1].mxu0 }
  0xea   :  { %v1120_v59 = vadd.f32 %v1119_v58, %v138_v51  ;;  %v425_v61 = vmul.f32 0.1, %v331_v53 }
  0xeb   :  { %v1212_v62 = vmul.f32 0.1, %v1118_v56  ;;  %v336_v63 = vpop.f32.mrb[2].mxu1  ;;  %v426_v0 = vmul.f32 0.1, %v333_v57 }
  0xec   :  { %v337_v1 = vadd.f32 %v336_v63, %v143_v60  ;;  %v1123_v2 = vpop.f32.mrb[2].mxu0  ;;  %v338_v3 = vpop.f32.mrb[3].mxu1  ;;  %v1213_v9 = vmul.f32 0.1, %v1120_v59  ;;  %v457_v12 = vmax.f32 %v331_v53, %v425_v61 }
  0xed   :  { %v1124_v6 = vadd.f32 %v1123_v2, %v143_v60  ;;  %v339_v7 = vadd.f32 %v338_v3, %v143_v60  ;;  %v1125_v8 = vpop.f32.mrb[3].mxu0  ;;  %v1244_v13 = vmax.f32 %v1118_v56, %v1212_v62  ;;  %v458_v17 = vmax.f32 %v333_v57, %v426_v0 }
  0xee   :  { %v427_v10 = vmul.f32 0.1, %v337_v1  ;;  %v1126_v11 = vadd.f32 %v1125_v8, %v143_v60  ;;  %v1245_v28 = vmax.f32 %v1120_v59, %v1213_v9 }
  0xef   :  { %v1214_v14 = vmul.f32 0.1, %v1124_v6  ;;  %v428_v15 = vmul.f32 0.1, %v339_v7  ;;  %v342_v16 = vpop.f32.mrb[4].mxu1 }
  0xf0   :  { %v459_v18 = vmax.f32 %v337_v1, %v427_v10  ;;  %v1215_v19 = vmul.f32 0.1, %v1126_v11  ;;  %v343_v20 = vadd.f32 %v342_v16, %v148_v5  ;;  %v1129_v21 = vpop.f32.mrb[4].mxu0  ;;  %v344_v22 = vpop.f32.mrb[5].mxu1 }
  0xf1   :  { %v1246_v23 = vmax.f32 %v1124_v6, %v1214_v14  ;;  %v460_v24 = vmax.f32 %v339_v7, %v428_v15  ;;  %v1130_v25 = vadd.f32 %v1129_v21, %v148_v5  ;;  %v345_v26 = vadd.f32 %v344_v22, %v148_v5  ;;  %v1131_v27 = vpop.f32.mrb[5].mxu0  ;;  %v163_v7 = vpop.permute.xlu1 %162 }
  0xf2   :  { %v1797_v29 = vpack.c.bf16 %v459_v18, %v457_v12  ;;  %v1247_v30 = vmax.f32 %v1126_v11, %v1215_v19  ;;  %v1132_v31 = vadd.f32 %v1131_v27, %v148_v5  ;;  %v429_v34 = vmul.f32 0.1, %v343_v20 }
  0xf3   :  { %v1845_v33 = vpack.c.bf16 %v1246_v23, %v1244_v13  ;;  %v1216_v35 = vmul.f32 0.1, %v1130_v25  ;;  %v348_v36 = vpop.f32.mrb[6].mxu1  ;;  %v1795_v37 = vpack.c.bf16 %v460_v24, %v458_v17  ;;  %v430_v38 = vmul.f32 0.1, %v345_v26  ;;  %v168_v24 = vpop.permute.xlu0 %167 }
  0xf4   :  { %v349_v39 = vadd.f32 %v348_v36, %v153_v32  ;;  %v1135_v40 = vpop.f32.mrb[6].mxu0  ;;  %v350_v41 = vpop.f32.mrb[7].mxu1  ;;  %v1843_v42 = vpack.c.bf16 %v1247_v30, %v1245_v28  ;;  %v1217_v46 = vmul.f32 0.1, %v1132_v31  ;;  %v461_v50 = vmax.f32 %v343_v20, %v429_v34 }
  0xf5   :  { %v1136_v43 = vadd.f32 %v1135_v40, %v153_v32  ;;  %v351_v44 = vadd.f32 %v350_v41, %v153_v32  ;;  %v1137_v45 = vpop.f32.mrb[7].mxu0  ;;  %1796 = vmatprep.subr.bf16.mxu1 %v1795_v37  ;;  %v1248_v51 = vmax.f32 %v1130_v25, %v1216_v35  ;;  %v462_v55 = vmax.f32 %v345_v26, %v430_v38 }
  0xf6   :  { %v431_v47 = vmul.f32 0.1, %v349_v39  ;;  %v1138_v48 = vadd.f32 %v1137_v45, %v153_v32  ;;  %1844 = vmatprep.subr.bf16.mxu0 %v1843_v42  ;;  %1798 = vmatpush1.bf16.msra.mxu1 %v1797_v29  ;;  %v1249_v2 = vmax.f32 %v1132_v31, %v1217_v46  ;;  %v173_v45 = vpop.permute.xlu1 %172 }
  0xf7   :  { %v1218_v52 = vmul.f32 0.1, %v1136_v43  ;;  %v432_v53 = vmul.f32 0.1, %v351_v44  ;;  %1846 = vmatpush1.bf16.msra.mxu0 %v1845_v33  ;;  %v354_v54 = vpop.f32.mrb[8].mxu1 }
  0xf8   :  { %v463_v56 = vmax.f32 %v349_v39, %v431_v47  ;;  %v1219_v57 = vmul.f32 0.1, %v1138_v48  ;;  %v355_v58 = vadd.f32 %v354_v54, %v158_v49  ;;  %v1141_v59 = vpop.f32.mrb[8].mxu0  ;;  %v356_v60 = vpop.f32.mrb[9].mxu1 }
  0xf9   :  { %v1250_v61 = vmax.f32 %v1136_v43, %v1218_v52  ;;  %v464_v62 = vmax.f32 %v351_v44, %v432_v53  ;;  %v1142_v63 = vadd.f32 %v1141_v59, %v158_v49  ;;  %v357_v0 = vadd.f32 %v356_v60, %v158_v49  ;;  %v1143_v1 = vpop.f32.mrb[9].mxu0 }
  0xfa   :  { %v1801_v3 = vpack.c.bf16 %v463_v56, %v461_v50  ;;  %v1251_v5 = vmax.f32 %v1138_v48, %v1219_v57  ;;  %v1144_v6 = vadd.f32 %v1143_v1, %v158_v49  ;;  %v433_v9 = vmul.f32 0.1, %v355_v58 }
  0xfb   :  { %v1849_v8 = vpack.c.bf16 %v1250_v61, %v1248_v51  ;;  %v1220_v10 = vmul.f32 0.1, %v1142_v63  ;;  %v360_v11 = vpop.f32.mrb[10].mxu1  ;;  %v1799_v12 = vpack.c.bf16 %v464_v62, %v462_v55  ;;  %v434_v13 = vmul.f32 0.1, %v357_v0  ;;  %v178_v62 = vpop.permute.xlu0 %177 }
  0xfc   :  { %v361_v14 = vadd.f32 %v360_v11, %v163_v7  ;;  %v1147_v15 = vpop.f32.mrb[10].mxu0  ;;  %v362_v16 = vpop.f32.mrb[11].mxu1  ;;  %v1847_v17 = vpack.c.bf16 %v1251_v5, %v1249_v2  ;;  %v1221_v21 = vmul.f32 0.1, %v1144_v6  ;;  %v465_v25 = vmax.f32 %v355_v58, %v433_v9 }
  0xfd   :  { %v1148_v18 = vadd.f32 %v1147_v15, %v163_v7  ;;  %v363_v19 = vadd.f32 %v362_v16, %v163_v7  ;;  %v1149_v20 = vpop.f32.mrb[11].mxu0  ;;  %1800 = vmatprep.subr.bf16.mxu1 %v1799_v12  ;;  %v1252_v26 = vmax.f32 %v1142_v63, %v1220_v10  ;;  %v466_v30 = vmax.f32 %v357_v0, %v434_v13 }
  0xfe   :  { %v435_v22 = vmul.f32 0.1, %v361_v14  ;;  %v1150_v23 = vadd.f32 %v1149_v20, %v163_v7  ;;  %1848 = vmatprep.subr.bf16.mxu0 %v1847_v17  ;;  %1802 = vmatpush1.bf16.msra.mxu1 %v1801_v3  ;;  %v1253_v41 = vmax.f32 %v1144_v6, %v1221_v21  ;;  %v183_v20 = vpop.permute.xlu1 %182 }
  0xff   :  { %v1222_v27 = vmul.f32 0.1, %v1148_v18  ;;  %v436_v28 = vmul.f32 0.1, %v363_v19  ;;  %1850 = vmatpush1.bf16.msra.mxu0 %v1849_v8  ;;  %v366_v29 = vpop.f32.mrb[12].mxu1 }
 0x100   :  { %v467_v31 = vmax.f32 %v361_v14, %v435_v22  ;;  %v1223_v32 = vmul.f32 0.1, %v1150_v23  ;;  %v367_v33 = vadd.f32 %v366_v29, %v168_v24  ;;  %v1153_v34 = vpop.f32.mrb[12].mxu0  ;;  %v368_v35 = vpop.f32.mrb[13].mxu1 }
 0x101   :  { %v1254_v36 = vmax.f32 %v1148_v18, %v1222_v27  ;;  %v468_v37 = vmax.f32 %v363_v19, %v436_v28  ;;  %v1154_v38 = vadd.f32 %v1153_v34, %v168_v24  ;;  %v369_v39 = vadd.f32 %v368_v35, %v168_v24  ;;  %v1155_v40 = vpop.f32.mrb[13].mxu0 }
 0x102   :  { %v1805_v42 = vpack.c.bf16 %v467_v31, %v465_v25  ;;  %v1255_v43 = vmax.f32 %v1150_v23, %v1223_v32  ;;  %v1156_v44 = vadd.f32 %v1155_v40, %v168_v24  ;;  %v437_v47 = vmul.f32 0.1, %v367_v33 }
 0x103   :  { %v1853_v46 = vpack.c.bf16 %v1254_v36, %v1252_v26  ;;  %v1224_v48 = vmul.f32 0.1, %v1154_v38  ;;  %v372_v49 = vpop.f32.mrb[14].mxu1  ;;  %v1803_v50 = vpack.c.bf16 %v468_v37, %v466_v30  ;;  %v438_v51 = vmul.f32 0.1, %v369_v39  ;;  %v188_v37 = vpop.permute.xlu0 %187 }
 0x104   :  { %v373_v52 = vadd.f32 %v372_v49, %v173_v45  ;;  %v1159_v53 = vpop.f32.mrb[14].mxu0  ;;  %v374_v54 = vpop.f32.mrb[15].mxu1  ;;  %v1851_v55 = vpack.c.bf16 %v1255_v43, %v1253_v41  ;;  %v1225_v59 = vmul.f32 0.1, %v1156_v44  ;;  %v469_v63 = vmax.f32 %v367_v33, %v437_v47 }
 0x105   :  { %v1160_v56 = vadd.f32 %v1159_v53, %v173_v45  ;;  %v375_v57 = vadd.f32 %v374_v54, %v173_v45  ;;  %v1161_v58 = vpop.f32.mrb[15].mxu0  ;;  %1804 = vmatprep.subr.bf16.mxu1 %v1803_v50  ;;  %v1256_v0 = vmax.f32 %v1154_v38, %v1224_v48  ;;  %v470_v5 = vmax.f32 %v369_v39, %v438_v51 }
 0x106   :  { %v439_v60 = vmul.f32 0.1, %v373_v52  ;;  %v1162_v61 = vadd.f32 %v1161_v58, %v173_v45  ;;  %1852 = vmatprep.subr.bf16.mxu0 %v1851_v55  ;;  %1806 = vmatpush1.bf16.msra.mxu1 %v1805_v42  ;;  %v1257_v16 = vmax.f32 %v1156_v44, %v1225_v59  ;;  %v193_v58 = vpop.permute.xlu1 %192 }
 0x107   :  { %v1226_v1 = vmul.f32 0.1, %v1160_v56  ;;  %v440_v2 = vmul.f32 0.1, %v375_v57  ;;  %1854 = vmatpush1.bf16.msra.mxu0 %v1853_v46  ;;  %v378_v3 = vpop.f32.mrb[16].mxu1 }
 0x108   :  { %v471_v6 = vmax.f32 %v373_v52, %v439_v60  ;;  %v1227_v7 = vmul.f32 0.1, %v1162_v61  ;;  %v379_v8 = vadd.f32 %v378_v3, %v178_v62  ;;  %v1165_v9 = vpop.f32.mrb[16].mxu0  ;;  %v380_v10 = vpop.f32.mrb[17].mxu1 }
 0x109   :  { %v1258_v11 = vmax.f32 %v1160_v56, %v1226_v1  ;;  %v472_v12 = vmax.f32 %v375_v57, %v440_v2  ;;  %v1166_v13 = vadd.f32 %v1165_v9, %v178_v62  ;;  %v381_v14 = vadd.f32 %v380_v10, %v178_v62  ;;  %v1167_v15 = vpop.f32.mrb[17].mxu0 }
 0x10a   :  { %v1809_v17 = vpack.c.bf16 %v471_v6, %v469_v63  ;;  %v1259_v18 = vmax.f32 %v1162_v61, %v1227_v7  ;;  %v1168_v19 = vadd.f32 %v1167_v15, %v178_v62  ;;  %v441_v22 = vmul.f32 0.1, %v379_v8 }
 0x10b   :  { %v1857_v21 = vpack.c.bf16 %v1258_v11, %v1256_v0  ;;  %v1228_v23 = vmul.f32 0.1, %v1166_v13  ;;  %v384_v24 = vpop.f32.mrb[18].mxu1  ;;  %v1807_v25 = vpack.c.bf16 %v472_v12, %v470_v5  ;;  %v442_v26 = vmul.f32 0.1, %v381_v14  ;;  %v198_v12 = vpop.permute.xlu0 %197 }
 0x10c   :  { %v385_v27 = vadd.f32 %v384_v24, %v183_v20  ;;  %v1171_v28 = vpop.f32.mrb[18].mxu0  ;;  %v386_v29 = vpop.f32.mrb[19].mxu1  ;;  %v1855_v30 = vpack.c.bf16 %v1259_v18, %v1257_v16  ;;  %v1229_v34 = vmul.f32 0.1, %v1168_v19  ;;  %v473_v38 = vmax.f32 %v379_v8, %v441_v22 }
 0x10d   :  { %v1172_v31 = vadd.f32 %v1171_v28, %v183_v20  ;;  %v387_v32 = vadd.f32 %v386_v29, %v183_v20  ;;  %v1173_v33 = vpop.f32.mrb[19].mxu0  ;;  %1808 = vmatprep.subr.bf16.mxu1 %v1807_v25  ;;  %v1260_v39 = vmax.f32 %v1166_v13, %v1228_v23  ;;  %v474_v43 = vmax.f32 %v381_v14, %v442_v26 }
 0x10e   :  { %v443_v35 = vmul.f32 0.1, %v385_v27  ;;  %v1174_v36 = vadd.f32 %v1173_v33, %v183_v20  ;;  %1856 = vmatprep.subr.bf16.mxu0 %v1855_v30  ;;  %1810 = vmatpush1.bf16.msra.mxu1 %v1809_v17  ;;  %v1261_v54 = vmax.f32 %v1168_v19, %v1229_v34  ;;  %v203_v33 = vpop.permute.xlu1 %202 }
 0x10f   :  { %v1230_v40 = vmul.f32 0.1, %v1172_v31  ;;  %v444_v41 = vmul.f32 0.1, %v387_v32  ;;  %1858 = vmatpush1.bf16.msra.mxu0 %v1857_v21  ;;  %v390_v42 = vpop.f32.mrb[20].mxu1 }
 0x110   :  { %v475_v44 = vmax.f32 %v385_v27, %v443_v35  ;;  %v1231_v45 = vmul.f32 0.1, %v1174_v36  ;;  %v391_v46 = vadd.f32 %v390_v42, %v188_v37  ;;  %v1177_v47 = vpop.f32.mrb[20].mxu0  ;;  %v392_v48 = vpop.f32.mrb[21].mxu1 }
 0x111   :  { %v1262_v49 = vmax.f32 %v1172_v31, %v1230_v40  ;;  %v476_v50 = vmax.f32 %v387_v32, %v444_v41  ;;  %v1178_v51 = vadd.f32 %v1177_v47, %v188_v37  ;;  %v393_v52 = vadd.f32 %v392_v48, %v188_v37  ;;  %v1179_v53 = vpop.f32.mrb[21].mxu0 }
 0x112   :  { %v1813_v55 = vpack.c.bf16 %v475_v44, %v473_v38  ;;  %v1263_v56 = vmax.f32 %v1174_v36, %v1231_v45  ;;  %v1180_v57 = vadd.f32 %v1179_v53, %v188_v37  ;;  %v445_v60 = vmul.f32 0.1, %v391_v46 }
 0x113   :  { %v1861_v59 = vpack.c.bf16 %v1262_v49, %v1260_v39  ;;  %v1232_v61 = vmul.f32 0.1, %v1178_v51  ;;  %v396_v62 = vpop.f32.mrb[22].mxu1  ;;  %v1811_v63 = vpack.c.bf16 %v476_v50, %v474_v43  ;;  %v446_v0 = vmul.f32 0.1, %v393_v52  ;;  %v208_v50 = vpop.permute.xlu0 %207 }
 0x114   :  { %v397_v1 = vadd.f32 %v396_v62, %v193_v58  ;;  %v1183_v2 = vpop.f32.mrb[22].mxu0  ;;  %v398_v3 = vpop.f32.mrb[23].mxu1  ;;  %v1859_v5 = vpack.c.bf16 %v1263_v56, %v1261_v54  ;;  %v1233_v9 = vmul.f32 0.1, %v1180_v57  ;;  %v477_v13 = vmax.f32 %v391_v46, %v445_v60 }
 0x115   :  { %v1184_v6 = vadd.f32 %v1183_v2, %v193_v58  ;;  %v399_v7 = vadd.f32 %v398_v3, %v193_v58  ;;  %v1185_v8 = vpop.f32.mrb[23].mxu0  ;;  %1812 = vmatprep.subr.bf16.mxu1 %v1811_v63  ;;  %v1264_v14 = vmax.f32 %v1178_v51, %v1232_v61  ;;  %v478_v18 = vmax.f32 %v393_v52, %v446_v0 }
 0x116   :  { %v447_v10 = vmul.f32 0.1, %v397_v1  ;;  %v1186_v11 = vadd.f32 %v1185_v8, %v193_v58  ;;  %1860 = vmatprep.subr.bf16.mxu0 %v1859_v5  ;;  %1814 = vmatpush1.bf16.msra.mxu1 %v1813_v55  ;;  %v1265_v29 = vmax.f32 %v1180_v57, %v1233_v9  ;;  %v213_v8 = vpop.permute.xlu1 %212 }
 0x117   :  { %v1234_v15 = vmul.f32 0.1, %v1184_v6  ;;  %v448_v16 = vmul.f32 0.1, %v399_v7  ;;  %1862 = vmatpush1.bf16.msra.mxu0 %v1861_v59  ;;  %v402_v17 = vpop.f32.mrb[24].mxu1 }
 0x118   :  { %v479_v19 = vmax.f32 %v397_v1, %v447_v10  ;;  %v1235_v20 = vmul.f32 0.1, %v1186_v11  ;;  %v403_v21 = vadd.f32 %v402_v17, %v198_v12  ;;  %v1189_v22 = vpop.f32.mrb[24].mxu0  ;;  %v404_v23 = vpop.f32.mrb[25].mxu1 }
 0x119   :  { %v1266_v24 = vmax.f32 %v1184_v6, %v1234_v15  ;;  %v480_v25 = vmax.f32 %v399_v7, %v448_v16  ;;  %v1190_v26 = vadd.f32 %v1189_v22, %v198_v12  ;;  %v405_v27 = vadd.f32 %v404_v23, %v198_v12  ;;  %v1191_v28 = vpop.f32.mrb[25].mxu0 }
 0x11a   :  { %v1817_v30 = vpack.c.bf16 %v479_v19, %v477_v13  ;;  %v1267_v31 = vmax.f32 %v1186_v11, %v1235_v20  ;;  %v1192_v32 = vadd.f32 %v1191_v28, %v198_v12  ;;  %v449_v35 = vmul.f32 0.1, %v403_v21 }
 0x11b   :  { %v1865_v34 = vpack.c.bf16 %v1266_v24, %v1264_v14  ;;  %v1236_v36 = vmul.f32 0.1, %v1190_v26  ;;  %v408_v37 = vpop.f32.mrb[26].mxu1  ;;  %v1815_v38 = vpack.c.bf16 %v480_v25, %v478_v18  ;;  %v450_v39 = vmul.f32 0.1, %v405_v27 }
 0x11c   :  { %v409_v40 = vadd.f32 %v408_v37, %v203_v33  ;;  %v1195_v41 = vpop.f32.mrb[26].mxu0  ;;  %v410_v42 = vpop.f32.mrb[27].mxu1  ;;  %v1863_v43 = vpack.c.bf16 %v1267_v31, %v1265_v29  ;;  %v1237_v47 = vmul.f32 0.1, %v1192_v32  ;;  %v481_v51 = vmax.f32 %v403_v21, %v449_v35 }
 0x11d   :  { %v1196_v44 = vadd.f32 %v1195_v41, %v203_v33  ;;  %v411_v45 = vadd.f32 %v410_v42, %v203_v33  ;;  %v1197_v46 = vpop.f32.mrb[27].mxu0  ;;  %1816 = vmatprep.subr.bf16.mxu1 %v1815_v38  ;;  %v1268_v52 = vmax.f32 %v1190_v26, %v1236_v36  ;;  %v482_v56 = vmax.f32 %v405_v27, %v450_v39  ;;  %v56_v41 = vld [vmem:[%s3104_s4 + $0x8] sm:$0xff]  ;;  %v57_v42 = vld [vmem:[%s3104_s4 + $0x10] sm:$0xff] }
 0x11e   :  { %v451_v48 = vmul.f32 0.1, %v409_v40  ;;  %v1198_v49 = vadd.f32 %v1197_v46, %v203_v33  ;;  %1864 = vmatprep.subr.bf16.mxu0 %v1863_v43  ;;  %1818 = vmatpush1.bf16.msra.mxu1 %v1817_v30  ;;  %v1269_v3 = vmax.f32 %v1192_v32, %v1237_v47  ;;  %v58_v43 = vld [vmem:[%s3104_s4 + $0x18] sm:$0xff]  ;;  %v61_v46 = vld [vmem:[%s3104_s4 + $0x30] sm:$0xff] }
 0x11f   :  { %v1238_v53 = vmul.f32 0.1, %v1196_v44  ;;  %v452_v54 = vmul.f32 0.1, %v411_v45  ;;  %1866 = vmatpush1.bf16.msra.mxu0 %v1865_v34  ;;  %v414_v55 = vpop.f32.mrb[28].mxu1  ;;  %v62_v47 = vld [vmem:[%s3104_s4 + $0x38] sm:$0xff] }
 0x120   :  { %v483_v57 = vmax.f32 %v409_v40, %v451_v48  ;;  %v1239_v58 = vmul.f32 0.1, %v1198_v49  ;;  %v415_v59 = vadd.f32 %v414_v55, %v208_v50  ;;  %v1201_v60 = vpop.f32.mrb[28].mxu0  ;;  %v416_v61 = vpop.f32.mrb[29].mxu1  ;;  %v55_v40 = vld [vmem:[%s3104_s4] sm:$0xff]  ;;  %v70_v55 = vld [vmem:[%s3104_s4 + $0x78] sm:$0xff] }
 0x121   :  { %v1270_v62 = vmax.f32 %v1196_v44, %v1238_v53  ;;  %v484_v63 = vmax.f32 %v411_v45, %v452_v54  ;;  %v1202_v0 = vadd.f32 %v1201_v60, %v208_v50  ;;  %v417_v1 = vadd.f32 %v416_v61, %v208_v50  ;;  %v1203_v2 = vpop.f32.mrb[29].mxu0  ;;  %v59_v44 = vld [vmem:[%s3104_s4 + $0x20] sm:$0xff]  ;;  %v60_v45 = vld [vmem:[%s3104_s4 + $0x28] sm:$0xff]  ;;  %v69_v54 = vld [vmem:[%s3104_s4 + $0x70] sm:$0xff] }
 0x122   :  { %v1821_v5 = vpack.c.bf16 %v483_v57, %v481_v51  ;;  %v1271_v6 = vmax.f32 %v1198_v49, %v1239_v58  ;;  %v1204_v7 = vadd.f32 %v1203_v2, %v208_v50  ;;  %v453_v12 = vmul.f32 0.1, %v415_v59  ;;  %v63_v48 = vld [vmem:[%s3104_s4 + $0x40] sm:$0xff]  ;;  %v64_v49 = vld [vmem:[%s3104_s4 + $0x48] sm:$0xff]  ;;  %v65_v50 = vld [vmem:[%s3104_s4 + $0x50] sm:$0xff] }
 0x123   :  { %v1869_v9 = vpack.c.bf16 %v1270_v62, %v1268_v52  ;;  %v420_v10 = vpop.f32.mrb[30].mxu1  ;;  %v1819_v11 = vpack.c.bf16 %v484_v63, %v482_v56  ;;  %v1240_v17 = vmul.f32 0.1, %v1202_v0  ;;  %v454_v18 = vmul.f32 0.1, %v417_v1  ;;  %v66_v51 = vld [vmem:[%s3104_s4 + $0x58] sm:$0xff] }
 0x124   :  { %v421_v13 = vadd.f32 %v420_v10, %v213_v8  ;;  %v1207_v14 = vpop.f32.mrb[30].mxu0  ;;  %v422_v15 = vpop.f32.mrb[31].mxu1  ;;  %v1867_v16 = vpack.c.bf16 %v1271_v6, %v1269_v3  ;;  %v1241_v22 = vmul.f32 0.1, %v1204_v7  ;;  %v485_v27 = vmax.f32 %v415_v59, %v453_v12  ;;  %v67_v52 = vld [vmem:[%s3104_s4 + $0x60] sm:$0xff]  ;;  %v68_v53 = vld [vmem:[%s3104_s4 + $0x68] sm:$0xff] }
 0x125   :  { %v1208_v19 = vadd.f32 %v1207_v14, %v213_v8  ;;  %v423_v20 = vadd.f32 %v422_v15, %v213_v8  ;;  %v1209_v21 = vpop.f32.mrb[31].mxu0  ;;  %1820 = vmatprep.subr.bf16.mxu1 %v1819_v11  ;;  %v1272_v30 = vmax.f32 %v1202_v0, %v1240_v17  ;;  %v486_v31 = vmax.f32 %v417_v1, %v454_v18  ;;  %v71_v56 = vld [vmem:[%s3104_s4 + $0x80] sm:$0xff]  ;;  %v72_v57 = vld [vmem:[%s3104_s4 + $0x88] sm:$0xff]  ;;  %v73_v58 = vld [vmem:[%s3104_s4 + $0x90] sm:$0xff] }
 0x126   :  { %v455_v23 = vmul.f32 0.1, %v421_v13  ;;  %v1210_v24 = vadd.f32 %v1209_v21, %v213_v8  ;;  %1868 = vmatprep.subr.bf16.mxu0 %v1867_v16  ;;  %1822 = vmatpush1.bf16.msra.mxu1 %v1821_v5  ;;  %v1273_v34 = vmax.f32 %v1204_v7, %v1241_v22  ;;  %v74_v59 = vld [vmem:[%s3104_s4 + $0x98] sm:$0xff]  ;;  %v75_v60 = vld [vmem:[%s3104_s4 + $0xa0] sm:$0xff]  ;;  %v76_v61 = vld [vmem:[%s3104_s4 + $0xa8] sm:$0xff] }
 0x127   :  { %v1242_v25 = vmul.f32 0.1, %v1208_v19  ;;  %v456_v26 = vmul.f32 0.1, %v423_v20  ;;  %1870 = vmatpush1.bf16.msra.mxu0 %v1869_v9  ;;  %v77_v62 = vld [vmem:[%s3104_s4 + $0xb0] sm:$0xff]  ;;  %v78_v63 = vld [vmem:[%s3104_s4 + $0xb8] sm:$0xff] }
 0x128   :  { %v487_v28 = vmax.f32 %v421_v13, %v455_v23  ;;  %v1243_v29 = vmul.f32 0.1, %v1210_v24  ;;  %v79_v0 = vld [vmem:[%s3104_s4 + $0xc0] sm:$0xff]  ;;  %v80_v1 = vld [vmem:[%s3104_s4 + $0xc8] sm:$0xff]  ;;  %v81_v2 = vld [vmem:[%s3104_s4 + $0xd0] sm:$0xff] }
 0x129   :  { %v1274_v32 = vmax.f32 %v1208_v19, %v1242_v25  ;;  %v488_v33 = vmax.f32 %v423_v20, %v456_v26  ;;  %v82_v3 = vld [vmem:[%s3104_s4 + $0xd8] sm:$0xff]  ;;  %v83_v5 = vld [vmem:[%s3104_s4 + $0xe0] sm:$0xff]  ;;  %v84_v6 = vld [vmem:[%s3104_s4 + $0xe8] sm:$0xff] }
 0x12a   :  { %v1825_v35 = vpack.c.bf16 %v487_v28, %v485_v27  ;;  %v1275_v36 = vmax.f32 %v1210_v24, %v1243_v29  ;;  %v85_v7 = vld [vmem:[%s3104_s4 + $0xf0] sm:$0xff]  ;;  %v86_v8 = vld [vmem:[%s3104_s4 + $0xf8] sm:$0xff]  ;;  %v2460_v24 = vpop.permute.xlu0 %491  ;;  %v2470_v29 = vpop.permute.xlu1 %496 }
 0x12b   :  { %v1873_v37 = vpack.c.bf16 %v1274_v32, %v1272_v30  ;;  %v1823_v38 = vpack.c.bf16 %v488_v33, %v486_v31 }
 0x12c   :  { %v1871_v39 = vpack.c.bf16 %v1275_v36, %v1273_v34 }
 0x12d   :  { %1824 = vmatprep.subr.bf16.mxu1 %v1823_v38 }
 0x12e   :  { %1872 = vmatprep.subr.bf16.mxu0 %v1871_v39  ;;  %1826 = vmatpush1.bf16.msra.mxu1 %v1825_v35  ;;  %v2478_v33 = vpop.permute.xlu0 %501  ;;  %v2488_v38 = vpop.permute.xlu1 %506 }
 0x12f   :  { %1874 = vmatpush1.bf16.msra.mxu0 %v1873_v37 }
 0x131   :  { %714 = vmatmul.mubr.f32.vlgmr.msra.gmra.mrb[32].mxu1 %v55_v40 }
 0x132   :  { %1341 = vmatmul.mubr.f32.vlgmr.msra.gmra.mrb[32].mxu0 %v55_v40  ;;  %719 = vmatprep.mubr.f32.mxu1 %v1880_v4  ;;  %v2492_v40 = vpop.permute.xlu0 %511 }
 0x133   :  { %1346 = vmatprep.mubr.f32.mxu0 %v1880_v4 }
 0x135   :  { %720 = vmatmul.mubr.f32.gmra.mrb[34].mxu1 %v56_v41 }
 0x136   :  { %1347 = vmatmul.mubr.f32.gmra.mrb[34].mxu0 %v56_v41  ;;  %725 = vmatprep.mubr.f32.mxu1 %v1880_v4 }
 0x137   :  { %1352 = vmatprep.mubr.f32.mxu0 %v1880_v4 }
 0x139   :  { %726 = vmatmul.mubr.f32.gmra.mrb[36].mxu1 %v57_v42 }
 0x13a   :  { %1353 = vmatmul.mubr.f32.gmra.mrb[36].mxu0 %v57_v42  ;;  %731 = vmatprep.mubr.f32.mxu1 %v1880_v4 }
 0x13b   :  { %1358 = vmatprep.mubr.f32.mxu0 %v1880_v4 }
 0x13d   :  { %732 = vmatmul.mubr.f32.gmra.mrb[38].mxu1 %v58_v43 }
 0x13e   :  { %1359 = vmatmul.mubr.f32.gmra.mrb[38].mxu0 %v58_v43  ;;  %737 = vmatprep.mubr.f32.mxu1 %v1880_v4 }
 0x13f   :  { %1364 = vmatprep.mubr.f32.mxu0 %v1880_v4 }
 0x141   :  { %738 = vmatmul.mubr.f32.gmra.mrb[40].mxu1 %v59_v44 }
 0x142   :  { %1365 = vmatmul.mubr.f32.gmra.mrb[40].mxu0 %v59_v44  ;;  %743 = vmatprep.mubr.f32.mxu1 %v1880_v4 }
 0x143   :  { %1370 = vmatprep.mubr.f32.mxu0 %v1880_v4 }
 0x145   :  { %744 = vmatmul.mubr.f32.gmra.mrb[42].mxu1 %v60_v45 }
 0x146   :  { %1371 = vmatmul.mubr.f32.gmra.mrb[42].mxu0 %v60_v45  ;;  %749 = vmatprep.mubr.f32.mxu1 %v1880_v4  ;;  %v2502_v45 = vpop.permute.xlu1 %516 }
 0x147   :  { %1376 = vmatprep.mubr.f32.mxu0 %v1880_v4 }
 0x149   :  { %750 = vmatmul.mubr.f32.gmra.mrb[44].mxu1 %v61_v46 }
 0x14a   :  { %1377 = vmatmul.mubr.f32.gmra.mrb[44].mxu0 %v61_v46  ;;  %755 = vmatprep.mubr.f32.mxu1 %v1880_v4 }
 0x14b   :  { %1382 = vmatprep.mubr.f32.mxu0 %v1880_v4 }
 0x14d   :  { %756 = vmatmul.mubr.f32.gmra.mrb[46].mxu1 %v62_v47 }
 0x14e   :  { %1383 = vmatmul.mubr.f32.gmra.mrb[46].mxu0 %v62_v47  ;;  %761 = vmatprep.mubr.f32.mxu1 %v1880_v4 }
 0x14f   :  { %1388 = vmatprep.mubr.f32.mxu0 %v1880_v4 }
 0x151   :  { %762 = vmatmul.mubr.f32.gmra.mrb[48].mxu1 %v63_v48 }
 0x152   :  { %1389 = vmatmul.mubr.f32.gmra.mrb[48].mxu0 %v63_v48  ;;  %767 = vmatprep.mubr.f32.mxu1 %v1880_v4 }
 0x153   :  { %1394 = vmatprep.mubr.f32.mxu0 %v1880_v4 }
 0x155   :  { %768 = vmatmul.mubr.f32.gmra.mrb[50].mxu1 %v64_v49 }
 0x156   :  { %1395 = vmatmul.mubr.f32.gmra.mrb[50].mxu0 %v64_v49  ;;  %773 = vmatprep.mubr.f32.mxu1 %v1880_v4  ;;  %v2510_v49 = vpop.permute.xlu0 %521 }
 0x157   :  { %1400 = vmatprep.mubr.f32.mxu0 %v1880_v4 }
 0x159   :  { %774 = vmatmul.mubr.f32.gmra.mrb[52].mxu1 %v65_v50 }
 0x15a   :  { %1401 = vmatmul.mubr.f32.gmra.mrb[52].mxu0 %v65_v50  ;;  %779 = vmatprep.mubr.f32.mxu1 %v1880_v4 }
 0x15b   :  { %1406 = vmatprep.mubr.f32.mxu0 %v1880_v4 }
 0x15d   :  { %780 = vmatmul.mubr.f32.gmra.mrb[54].mxu1 %v66_v51 }
 0x15e   :  { %1407 = vmatmul.mubr.f32.gmra.mrb[54].mxu0 %v66_v51  ;;  %785 = vmatprep.mubr.f32.mxu1 %v1880_v4 }
 0x15f   :  { %1412 = vmatprep.mubr.f32.mxu0 %v1880_v4 }
 0x161   :  { %786 = vmatmul.mubr.f32.gmra.mrb[56].mxu1 %v67_v52 }
 0x162   :  { %1413 = vmatmul.mubr.f32.gmra.mrb[56].mxu0 %v67_v52  ;;  %791 = vmatprep.mubr.f32.mxu1 %v1880_v4 }
 0x163   :  { %1418 = vmatprep.mubr.f32.mxu0 %v1880_v4 }
 0x165   :  { %792 = vmatmul.mubr.f32.gmra.mrb[58].mxu1 %v68_v53 }
 0x166   :  { %1419 = vmatmul.mubr.f32.gmra.mrb[58].mxu0 %v68_v53  ;;  %797 = vmatprep.mubr.f32.mxu1 %v1880_v4 }
 0x167   :  { %1424 = vmatprep.mubr.f32.mxu0 %v1880_v4 }
 0x169   :  { %798 = vmatmul.mubr.f32.gmra.mrb[60].mxu1 %v69_v54 }
 0x16a   :  { %1425 = vmatmul.mubr.f32.gmra.mrb[60].mxu0 %v69_v54  ;;  %803 = vmatprep.mubr.f32.mxu1 %v1880_v4  ;;  %v2520_v54 = vpop.permute.xlu1 %526 }
 0x16b   :  { %1430 = vmatprep.mubr.f32.mxu0 %v1880_v4 }
 0x16d   :  { %804 = vmatmul.mubr.f32.gmra.mrb[62].mxu1 %v70_v55 }
 0x16e   :  { %1431 = vmatmul.mubr.f32.gmra.mrb[62].mxu0 %v70_v55  ;;  %809 = vmatprep.mubr.f32.mxu1 %v1880_v4 }
 0x16f   :  { %1436 = vmatprep.mubr.f32.mxu0 %v1880_v4 }
 0x171   :  { %810 = vmatmul.mubr.f32.gmra.mrb[64].mxu1 %v71_v56 }
 0x172   :  { %1437 = vmatmul.mubr.f32.gmra.mrb[64].mxu0 %v71_v56  ;;  %815 = vmatprep.mubr.f32.mxu1 %v1880_v4  ;;  %v2524_v56 = vpop.permute.xlu0 %531 }
 0x173   :  { %1442 = vmatprep.mubr.f32.mxu0 %v1880_v4 }
 0x175   :  { %816 = vmatmul.mubr.f32.gmra.mrb[66].mxu1 %v72_v57 }
 0x176   :  { %1443 = vmatmul.mubr.f32.gmra.mrb[66].mxu0 %v72_v57  ;;  %821 = vmatprep.mubr.f32.mxu1 %v1880_v4 }
 0x177   :  { %1448 = vmatprep.mubr.f32.mxu0 %v1880_v4 }
 0x179   :  { %822 = vmatmul.mubr.f32.gmra.mrb[68].mxu1 %v73_v58 }
 0x17a   :  { %1449 = vmatmul.mubr.f32.gmra.mrb[68].mxu0 %v73_v58  ;;  %827 = vmatprep.mubr.f32.mxu1 %v1880_v4 }
 0x17b   :  { %1454 = vmatprep.mubr.f32.mxu0 %v1880_v4 }
 0x17d   :  { %828 = vmatmul.mubr.f32.gmra.mrb[70].mxu1 %v74_v59 }
 0x17e   :  { %1455 = vmatmul.mubr.f32.gmra.mrb[70].mxu0 %v74_v59  ;;  %833 = vmatprep.mubr.f32.mxu1 %v1880_v4 }
 0x17f   :  { %1460 = vmatprep.mubr.f32.mxu0 %v1880_v4 }
 0x181   :  { %834 = vmatmul.mubr.f32.gmra.mrb[72].mxu1 %v75_v60 }
 0x182   :  { %1461 = vmatmul.mubr.f32.gmra.mrb[72].mxu0 %v75_v60  ;;  %839 = vmatprep.mubr.f32.mxu1 %v1880_v4 }
 0x183   :  { %1466 = vmatprep.mubr.f32.mxu0 %v1880_v4 }
 0x185   :  { %840 = vmatmul.mubr.f32.gmra.mrb[74].mxu1 %v76_v61 }
 0x186   :  { %1467 = vmatmul.mubr.f32.gmra.mrb[74].mxu0 %v76_v61  ;;  %845 = vmatprep.mubr.f32.mxu1 %v1880_v4  ;;  %v2534_v61 = vpop.permute.xlu1 %536 }
 0x187   :  { %1472 = vmatprep.mubr.f32.mxu0 %v1880_v4 }
 0x189   :  { %846 = vmatmul.mubr.f32.gmra.mrb[76].mxu1 %v77_v62 }
 0x18a   :  { %1473 = vmatmul.mubr.f32.gmra.mrb[76].mxu0 %v77_v62  ;;  %851 = vmatprep.mubr.f32.mxu1 %v1880_v4 }
 0x18b   :  { %1478 = vmatprep.mubr.f32.mxu0 %v1880_v4 }
 0x18d   :  { %852 = vmatmul.mubr.f32.gmra.mrb[78].mxu1 %v78_v63 }
 0x18e   :  { %1479 = vmatmul.mubr.f32.gmra.mrb[78].mxu0 %v78_v63  ;;  %857 = vmatprep.mubr.f32.mxu1 %v1880_v4 }
 0x18f   :  { %1484 = vmatprep.mubr.f32.mxu0 %v1880_v4 }
 0x191   :  { %858 = vmatmul.mubr.f32.gmra.mrb[80].mxu1 %v79_v0 }
 0x192   :  { %1485 = vmatmul.mubr.f32.gmra.mrb[80].mxu0 %v79_v0  ;;  %863 = vmatprep.mubr.f32.mxu1 %v1880_v4 }
 0x193   :  { %1490 = vmatprep.mubr.f32.mxu0 %v1880_v4 }
 0x195   :  { %864 = vmatmul.mubr.f32.gmra.mrb[82].mxu1 %v80_v1 }
 0x196   :  { %1491 = vmatmul.mubr.f32.gmra.mrb[82].mxu0 %v80_v1  ;;  %869 = vmatprep.mubr.f32.mxu1 %v1880_v4  ;;  %v2542_v1 = vpop.permute.xlu0 %541 }
 0x197   :  { %1496 = vmatprep.mubr.f32.mxu0 %v1880_v4  ;;  %3124 = vst [vmem:[#allocation13_spill] sm:$0xff] %v2542_v1 }
 0x199   :  { %870 = vmatmul.mubr.f32.gmra.mrb[84].mxu1 %v81_v2 }
 0x19a   :  { %1497 = vmatmul.mubr.f32.gmra.mrb[84].mxu0 %v81_v2  ;;  %875 = vmatprep.mubr.f32.mxu1 %v1880_v4 }
 0x19b   :  { %1502 = vmatprep.mubr.f32.mxu0 %v1880_v4 }
 0x19d   :  { %876 = vmatmul.mubr.f32.gmra.mrb[86].mxu1 %v82_v3 }
 0x19e   :  { %1503 = vmatmul.mubr.f32.gmra.mrb[86].mxu0 %v82_v3  ;;  %881 = vmatprep.mubr.f32.mxu1 %v1880_v4 }
 0x19f   :  { %1508 = vmatprep.mubr.f32.mxu0 %v1880_v4 }
 0x1a1   :  { %882 = vmatmul.mubr.f32.gmra.mrb[88].mxu1 %v83_v5 }
 0x1a2   :  { %1509 = vmatmul.mubr.f32.gmra.mrb[88].mxu0 %v83_v5  ;;  %887 = vmatprep.mubr.f32.mxu1 %v1880_v4 }
 0x1a3   :  { %1514 = vmatprep.mubr.f32.mxu0 %v1880_v4 }
 0x1a5   :  { %888 = vmatmul.mubr.f32.gmra.mrb[90].mxu1 %v84_v6 }
 0x1a6   :  { %1515 = vmatmul.mubr.f32.gmra.mrb[90].mxu0 %v84_v6  ;;  %893 = vmatprep.mubr.f32.mxu1 %v1880_v4 }
 0x1a7   :  { %1520 = vmatprep.mubr.f32.mxu0 %v1880_v4 }
 0x1a9   :  { %894 = vmatmul.mubr.f32.gmra.mrb[92].mxu1 %v85_v7 }
 0x1aa   :  { %1521 = vmatmul.mubr.f32.gmra.mrb[92].mxu0 %v85_v7  ;;  %899 = vmatprep.mubr.f32.mxu1 %v1880_v4  ;;  %v2552_v7 = vpop.permute.xlu1 %546 }
 0x1ab   :  { %1526 = vmatprep.mubr.f32.mxu0 %v1880_v4  ;;  %3129 = vst [vmem:[#allocation18_spill] sm:$0xff] %v2552_v7 }
 0x1ad   :  { %900 = vmatmul.mubr.f32.gmra.mrb[94].mxu1 %v86_v8 }
 0x1ae   :  { %1527 = vmatmul.mubr.f32.gmra.mrb[94].mxu0 %v86_v8 }
 0x204   :  { %v2428_v9 = vpop.f32.mrb[32].mxu1 }
 0x205   :  { %v2430_v10 = vpop.f32.mrb[32].mxu0  ;;  %v2432_v11 = vpop.f32.mrb[33].mxu1 }
 0x206   :  { %v2434_v12 = vpop.f32.mrb[33].mxu0 }
 0x208   :  { %v2436_v13 = vpop.f32.mrb[34].mxu1 }
 0x209   :  { %v2438_v14 = vpop.f32.mrb[34].mxu0  ;;  %v2440_v15 = vpop.f32.mrb[35].mxu1 }
 0x20a   :  { %v2442_v16 = vpop.f32.mrb[35].mxu0 }
 0x20c   :  { %v2444_v17 = vpop.f32.mrb[36].mxu1 }
 0x20d   :  { %v2446_v4 = vpop.f32.mrb[36].mxu0  ;;  %v2448_v18 = vpop.f32.mrb[37].mxu1 }
 0x20e   :  { %v2450_v19 = vpop.f32.mrb[37].mxu0 }
 0x210   :  { %v2452_v20 = vpop.f32.mrb[38].mxu1 }
 0x211   :  { %v2454_v21 = vpop.f32.mrb[38].mxu0  ;;  %v2456_v22 = vpop.f32.mrb[39].mxu1 }
 0x212   :  { %v2458_v23 = vpop.f32.mrb[39].mxu0 }
 0x214   :  { %v2462_v25 = vpop.f32.mrb[40].mxu1 }
 0x215   :  { %v2464_v26 = vpop.f32.mrb[40].mxu0  ;;  %v2466_v27 = vpop.f32.mrb[41].mxu1 }
 0x216   :  { %v2468_v28 = vpop.f32.mrb[41].mxu0 }
 0x218   :  { %v2472_v30 = vpop.f32.mrb[42].mxu1 }
 0x219   :  { %v2474_v31 = vpop.f32.mrb[42].mxu0  ;;  %v2476_v32 = vpop.f32.mrb[43].mxu1 }
 0x21a   :  { %v2480_v34 = vpop.f32.mrb[43].mxu0 }
 0x21c   :  { %v2482_v35 = vpop.f32.mrb[44].mxu1 }
 0x21d   :  { %v2484_v36 = vpop.f32.mrb[44].mxu0  ;;  %v2486_v37 = vpop.f32.mrb[45].mxu1 }
 0x21e   :  { %v2490_v39 = vpop.f32.mrb[45].mxu0 }
 0x220   :  { %v2494_v41 = vpop.f32.mrb[46].mxu1 }
 0x221   :  { %v2496_v42 = vpop.f32.mrb[46].mxu0  ;;  %v2498_v43 = vpop.f32.mrb[47].mxu1 }
 0x222   :  { %v2500_v44 = vpop.f32.mrb[47].mxu0 }
 0x224   :  { %v2504_v46 = vpop.f32.mrb[48].mxu1 }
 0x225   :  { %v2506_v47 = vpop.f32.mrb[48].mxu0  ;;  %v2508_v48 = vpop.f32.mrb[49].mxu1 }
 0x226   :  { %v2512_v50 = vpop.f32.mrb[49].mxu0 }
 0x228   :  { %v2514_v51 = vpop.f32.mrb[50].mxu1 }
 0x229   :  { %3113 = vst [vmem:[#allocation2_spill] sm:$0xff] %v2514_v51  ;;  %v2516_v52 = vpop.f32.mrb[50].mxu0  ;;  %v2518_v53 = vpop.f32.mrb[51].mxu1 }
 0x22a   :  { %3114 = vst [vmem:[#allocation3_spill] sm:$0xff] %v2516_v52  ;;  %3115 = vst [vmem:[#allocation4_spill] sm:$0xff] %v2518_v53  ;;  %v2522_v55 = vpop.f32.mrb[51].mxu0 }
 0x22b   :  { %3116 = vst [vmem:[#allocation5_spill] sm:$0xff] %v2522_v55 }
 0x22c   :  { %v2526_v57 = vpop.f32.mrb[52].mxu1 }
 0x22d   :  { %3117 = vst [vmem:[#allocation6_spill] sm:$0xff] %v2526_v57  ;;  %v2528_v58 = vpop.f32.mrb[52].mxu0  ;;  %v2530_v59 = vpop.f32.mrb[53].mxu1 }
 0x22e   :  { %3118 = vst [vmem:[#allocation7_spill] sm:$0xff] %v2528_v58  ;;  %3119 = vst [vmem:[#allocation8_spill] sm:$0xff] %v2530_v59  ;;  %v2532_v60 = vpop.f32.mrb[53].mxu0  ;;  %v722_v58 = vadd.f32 %v2436_v13, %v2470_v29  ;;  %v1717_v13 = vld [vmem:[%s3105_s0 + $0x110] sm:$0xff] }
 0x22f   :  { %3120 = vst [vmem:[#allocation9_spill] sm:$0xff] %v2532_v60  ;;  %v2556_v60 = vpop.permute.xlu0 %551 }
 0x230   :  { %v2536_v62 = vpop.f32.mrb[54].mxu1  ;;  %3131 = vst [vmem:[#allocation20_spill] sm:$0xff] %v2556_v60 }
 0x231   :  { %3121 = vst [vmem:[#allocation10_spill] sm:$0xff] %v2536_v62  ;;  %v2538_v63 = vpop.f32.mrb[54].mxu0  ;;  %v2540_v0 = vpop.f32.mrb[55].mxu1 }
 0x232   :  { %3122 = vst [vmem:[#allocation11_spill] sm:$0xff] %v2538_v63  ;;  %3123 = vst [vmem:[#allocation12_spill] sm:$0xff] %v2540_v0  ;;  %v2544_v2 = vpop.f32.mrb[55].mxu0 }
 0x233   :  { %3125 = vst [vmem:[#allocation14_spill] sm:$0xff] %v2544_v2  ;;  %v2566_v2 = vpop.permute.xlu1 %556  ;;  %v2574_v7 = vpop.permute.xlu0 %561 }
 0x234   :  { %v2546_v3 = vpop.f32.mrb[56].mxu1  ;;  %3136 = vst [vmem:[#allocation25_spill] sm:$0xff] %v2566_v2  ;;  %3140 = vst [vmem:[#allocation29_spill] sm:$0xff] %v2574_v7 }
 0x235   :  { %3126 = vst [vmem:[#allocation15_spill] sm:$0xff] %v2546_v3  ;;  %v2548_v5 = vpop.f32.mrb[56].mxu0  ;;  %v2550_v6 = vpop.f32.mrb[57].mxu1 }
 0x236   :  { %3127 = vst [vmem:[#allocation16_spill] sm:$0xff] %v2548_v5  ;;  %3128 = vst [vmem:[#allocation17_spill] sm:$0xff] %v2550_v6  ;;  %v2554_v8 = vpop.f32.mrb[57].mxu0 }
 0x237   :  { %3130 = vst [vmem:[#allocation19_spill] sm:$0xff] %v2554_v8 }
 0x238   :  { %v2558_v62 = vpop.f32.mrb[58].mxu1 }
 0x239   :  { %3132 = vst [vmem:[#allocation21_spill] sm:$0xff] %v2558_v62  ;;  %v2560_v63 = vpop.f32.mrb[58].mxu0  ;;  %v2562_v0 = vpop.f32.mrb[59].mxu1  ;;  %v716_v62 = vadd.f32 %v2428_v9, %v2460_v24  ;;  %v1715_v9 = vld [vmem:[%s3105_s0 + $0x100] sm:$0xff] }
 0x23a   :  { %3133 = vst [vmem:[#allocation22_spill] sm:$0xff] %v2560_v63  ;;  %3134 = vst [vmem:[#allocation23_spill] sm:$0xff] %v2562_v0  ;;  %v2564_v59 = vpop.f32.mrb[59].mxu0 }
 0x23b   :  { %3135 = vst [vmem:[#allocation24_spill] sm:$0xff] %v2564_v59  ;;  %v906_v59 = vld [vmem:[%s3105_s0] sm:$0xff] }
 0x23c   :  { %v2568_v3 = vpop.f32.mrb[60].mxu1  ;;  %v938_v2 = vmul.f32 %v906_v59, %v716_v62 }
 0x23d   :  { %3137 = vst [vmem:[#allocation26_spill] sm:$0xff] %v2568_v3  ;;  %v2570_v5 = vpop.f32.mrb[60].mxu0  ;;  %v2572_v6 = vpop.f32.mrb[61].mxu1  ;;  %v1343_v3 = vadd.f32 %v2430_v10, %v2460_v24  ;;  %v1345_v10 = vadd.f32 %v2434_v12, %v2460_v24  ;;  %v1349_v12 = vadd.f32 %v2438_v14, %v2470_v29 }
 0x23e   :  { %3138 = vst [vmem:[#allocation27_spill] sm:$0xff] %v2570_v5  ;;  %3139 = vst [vmem:[#allocation28_spill] sm:$0xff] %v2572_v6  ;;  %v2576_v8 = vpop.f32.mrb[61].mxu0  ;;  %v718_v5 = vadd.f32 %v2432_v11, %v2460_v24  ;;  %v572_v11 = vpop.permute.xlu0 %571  ;;  %v724_v24 = vadd.f32 %v2440_v15, %v2470_v29  ;;  %v1718_v15 = vld [vmem:[%s3105_s0 + $0x118] sm:$0xff] }
 0x23f   :  { %3141 = vst [vmem:[#allocation30_spill] sm:$0xff] %v2576_v8  ;;  %v2593_v8 = vpop.permute.xlu1 %566 }
 0x240   :  { %v2580_v63 = vpop.f32.mrb[62].mxu1  ;;  %3145 = vst [vmem:[#allocation34_spill] sm:$0xff] %v2593_v8  ;;  %v1566_v8 = vmul.f32 %v1715_v9, %v1343_v3 }
 0x241   :  { %3142 = vst [vmem:[#allocation31_spill] sm:$0xff] %v2580_v63  ;;  %v2589_v6 = vpop.f32.mrb[62].mxu0  ;;  %v2591_v7 = vpop.f32.mrb[63].mxu1  ;;  %v907_v63 = vld [vmem:[%s3105_s0 + $0x8] sm:$0xff] }
 0x242   :  { %3143 = vst [vmem:[#allocation32_spill] sm:$0xff] %v2589_v6  ;;  %3144 = vst [vmem:[#allocation33_spill] sm:$0xff] %v2591_v7  ;;  %v2601_v0 = vpop.f32.mrb[63].mxu0  ;;  %v1716_v7 = vld [vmem:[%s3105_s0 + $0x108] sm:$0xff]  ;;  %v939_v60 = vmul.f32 %v907_v63, %v718_v5  ;;  %v909_v5 = vld [vmem:[%s3105_s0 + $0x18] sm:$0xff] }
 0x243   :  { %3146 = vst [vmem:[#allocation35_spill] sm:$0xff] %v2601_v0  ;;  %v908_v0 = vld [vmem:[%s3105_s0 + $0x10] sm:$0xff]  ;;  %v1567_v63 = vmul.f32 %v1716_v7, %v1345_v10  ;;  %v577_v53 = vpop.permute.xlu1 %576 }
 0x244   :  { %v811_v6 = vpop.f32.mrb[64].mxu1  ;;  %v940_v51 = vmul.f32 %v908_v0, %v722_v58  ;;  %v1568_v58 = vmul.f32 %v1717_v13, %v1349_v12  ;;  %v941_v0 = vmul.f32 %v909_v5, %v724_v24  ;;  %v1357_v12 = vadd.f32 %v2450_v19, %v2478_v33  ;;  %v1720_v5 = vld [vmem:[%s3105_s0 + $0x128] sm:$0xff] }
 0x245   :  { %v812_v57 = vadd.f32 %v811_v6, %v572_v11  ;;  %v1438_v1 = vpop.f32.mrb[64].mxu0  ;;  %v813_v55 = vpop.f32.mrb[65].mxu1  ;;  %v1351_v6 = vadd.f32 %v2442_v16, %v2470_v29  ;;  %v910_v16 = vld [vmem:[%s3105_s0 + $0x20] sm:$0xff]  ;;  %v734_v19 = vadd.f32 %v2452_v20, %v2488_v38 }
 0x246   :  { %v1439_v59 = vadd.f32 %v1438_v1, %v572_v11  ;;  %v814_v62 = vadd.f32 %v813_v55, %v572_v11  ;;  %v1440_v3 = vpop.f32.mrb[65].mxu0  ;;  %v728_v55 = vadd.f32 %v2444_v17, %v2478_v33  ;;  %v1355_v1 = vadd.f32 %v2446_v4, %v2478_v33  ;;  %v1719_v29 = vld [vmem:[%s3105_s0 + $0x120] sm:$0xff] }
 0x247   :  { %v970_v9 = vadd.f32 %v938_v2, %v812_v57  ;;  %v1441_v14 = vadd.f32 %v1440_v3, %v572_v11  ;;  %v730_v57 = vadd.f32 %v2448_v18, %v2478_v33  ;;  %v582_v3 = vpop.permute.xlu0 %581 }
 0x248   :  { %v1598_v7 = vadd.f32 %v1566_v8, %v1439_v59  ;;  %v971_v10 = vadd.f32 %v939_v60, %v814_v62  ;;  %v817_v52 = vpop.f32.mrb[66].mxu1  ;;  %v911_v8 = vld [vmem:[%s3105_s0 + $0x28] sm:$0xff]  ;;  %v1570_v13 = vmul.f32 %v1719_v29, %v1355_v1  ;;  %v1361_v1 = vadd.f32 %v2454_v21, %v2488_v38  ;;  %v913_v21 = vld [vmem:[%s3105_s0 + $0x38] sm:$0xff] }
 0x249   :  { %1002 = vst [vmem:[%s3106_s6] sm:$0xff] %v970_v9  ;;  %v1599_v17 = vadd.f32 %v1567_v63, %v1441_v14  ;;  %v818_v4 = vadd.f32 %v817_v52, %v577_v53  ;;  %v1444_v60 = vpop.f32.mrb[66].mxu0  ;;  %v819_v2 = vpop.f32.mrb[67].mxu1  ;;  %v1569_v52 = vmul.f32 %v1718_v15, %v1351_v6  ;;  %v942_v63 = vmul.f32 %v910_v16, %v728_v55  ;;  %v912_v55 = vld [vmem:[%s3105_s0 + $0x30] sm:$0xff] }
 0x24a   :  { %1747 = vst [vmem:[%s3106_s6 + $0x100] sm:$0xff] %v1598_v7  ;;  %1003 = vst [vmem:[%s3106_s6 + $0x8] sm:$0xff] %v971_v10  ;;  %v1445_v18 = vadd.f32 %v1444_v60, %v577_v53  ;;  %v820_v11 = vadd.f32 %v819_v2, %v577_v53  ;;  %v1446_v59 = vpop.f32.mrb[67].mxu0  ;;  %v943_v6 = vmul.f32 %v911_v8, %v730_v57  ;;  %v587_v2 = vpop.permute.xlu1 %586 }
 0x24b   :  { %1748 = vst [vmem:[%s3106_s6 + $0x108] sm:$0xff] %v1599_v17  ;;  %v972_v24 = vadd.f32 %v940_v51, %v818_v4  ;;  %v1447_v62 = vadd.f32 %v1446_v59, %v577_v53  ;;  %v736_v10 = vadd.f32 %v2456_v22, %v2488_v38  ;;  %v1571_v57 = vmul.f32 %v1720_v5, %v1357_v12  ;;  %v1721_v17 = vld [vmem:[%s3105_s0 + $0x130] sm:$0xff]  ;;  %v914_v59 = vld [vmem:[%s3105_s0 + $0x40] sm:$0xff] }
 0x24c   :  { %v1600_v9 = vadd.f32 %v1568_v58, %v1445_v18  ;;  %v973_v14 = vadd.f32 %v941_v0, %v820_v11  ;;  %v823_v7 = vpop.f32.mrb[68].mxu1  ;;  %v1363_v22 = vadd.f32 %v2458_v23, %v2488_v38  ;;  %v1722_v58 = vld [vmem:[%s3105_s0 + $0x138] sm:$0xff]  ;;  %v740_v0 = vadd.f32 %v2462_v25, %v2492_v40 }
 0x24d   :  { %1004 = vst [vmem:[%s3106_s6 + $0x10] sm:$0xff] %v972_v24  ;;  %v1601_v33 = vadd.f32 %v1569_v52, %v1447_v62  ;;  %v824_v51 = vadd.f32 %v823_v7, %v582_v3  ;;  %v1450_v53 = vpop.f32.mrb[68].mxu0  ;;  %v825_v15 = vpop.f32.mrb[69].mxu1  ;;  %v1367_v8 = vadd.f32 %v2464_v26, %v2492_v40  ;;  %v944_v38 = vmul.f32 %v912_v55, %v734_v19  ;;  %v1723_v52 = vld [vmem:[%s3105_s0 + $0x140] sm:$0xff] }
 0x24e   :  { %1749 = vst [vmem:[%s3106_s6 + $0x110] sm:$0xff] %v1600_v9  ;;  %1005 = vst [vmem:[%s3106_s6 + $0x18] sm:$0xff] %v973_v14  ;;  %v1451_v20 = vadd.f32 %v1450_v53, %v582_v3  ;;  %v826_v16 = vadd.f32 %v825_v15, %v582_v3  ;;  %v1452_v29 = vpop.f32.mrb[69].mxu0  ;;  %v742_v12 = vadd.f32 %v2466_v27, %v2492_v40  ;;  %v1724_v15 = vld [vmem:[%s3105_s0 + $0x148] sm:$0xff] }
 0x24f   :  { %1750 = vst [vmem:[%s3106_s6 + $0x118] sm:$0xff] %v1601_v33  ;;  %v974_v4 = vadd.f32 %v942_v63, %v824_v51  ;;  %v1453_v60 = vadd.f32 %v1452_v29, %v582_v3  ;;  %v1572_v3 = vmul.f32 %v1721_v17, %v1361_v1  ;;  %v945_v63 = vmul.f32 %v913_v21, %v736_v10  ;;  %v592_v33 = vpop.permute.xlu0 %591  ;;  %v916_v17 = vld [vmem:[%s3105_s0 + $0x50] sm:$0xff] }
 0x250   :  { %v1602_v18 = vadd.f32 %v1570_v13, %v1451_v20  ;;  %v975_v11 = vadd.f32 %v943_v6, %v826_v16  ;;  %v829_v23 = vpop.f32.mrb[70].mxu1  ;;  %v915_v13 = vld [vmem:[%s3105_s0 + $0x48] sm:$0xff]  ;;  %v1573_v14 = vmul.f32 %v1722_v58, %v1363_v22  ;;  %v1369_v7 = vadd.f32 %v2468_v28, %v2492_v40  ;;  %v1725_v58 = vld [vmem:[%s3105_s0 + $0x150] sm:$0xff] }
 0x251   :  { %1006 = vst [vmem:[%s3106_s6 + $0x20] sm:$0xff] %v974_v4  ;;  %v1603_v25 = vadd.f32 %v1571_v57, %v1453_v60  ;;  %v830_v26 = vadd.f32 %v829_v23, %v587_v2  ;;  %v1456_v24 = vpop.f32.mrb[70].mxu0  ;;  %v831_v62 = vpop.f32.mrb[71].mxu1  ;;  %v946_v51 = vmul.f32 %v914_v59, %v740_v0  ;;  %v1574_v53 = vmul.f32 %v1723_v52, %v1367_v8 }
 0x252   :  { %1751 = vst [vmem:[%s3106_s6 + $0x120] sm:$0xff] %v1602_v18  ;;  %1007 = vst [vmem:[%s3106_s6 + $0x28] sm:$0xff] %v975_v11  ;;  %v1457_v27 = vadd.f32 %v1456_v24, %v587_v2  ;;  %v832_v5 = vadd.f32 %v831_v62, %v587_v2  ;;  %v1458_v9 = vpop.f32.mrb[71].mxu0  ;;  %v947_v20 = vmul.f32 %v915_v13, %v742_v12  ;;  %v597_v18 = vpop.permute.xlu1 %596  ;;  %v1726_v11 = vld [vmem:[%s3105_s0 + $0x158] sm:$0xff]  ;;  %v918_v12 = vld [vmem:[%s3105_s0 + $0x60] sm:$0xff] }
 0x253   :  { %1752 = vst [vmem:[%s3106_s6 + $0x128] sm:$0xff] %v1603_v25  ;;  %v976_v6 = vadd.f32 %v944_v38, %v830_v26  ;;  %v1459_v19 = vadd.f32 %v1458_v9, %v587_v2  ;;  %v746_v28 = vadd.f32 %v2472_v30, %v2502_v45  ;;  %v1373_v21 = vadd.f32 %v2474_v31, %v2502_v45  ;;  %v917_v31 = vld [vmem:[%s3105_s0 + $0x58] sm:$0xff]  ;;  %v1727_v25 = vld [vmem:[%s3105_s0 + $0x160] sm:$0xff]  ;;  %v919_v13 = vld [vmem:[%s3105_s0 + $0x68] sm:$0xff] }
 0x254   :  { %v1604_v55 = vadd.f32 %v1572_v3, %v1457_v27  ;;  %v977_v1 = vadd.f32 %v945_v63, %v832_v5  ;;  %v835_v10 = vpop.f32.mrb[72].mxu1  ;;  %v748_v22 = vadd.f32 %v2476_v32, %v2502_v45  ;;  %v1575_v2 = vmul.f32 %v1724_v15, %v1369_v7 }
 0x255   :  { %1008 = vst [vmem:[%s3106_s6 + $0x30] sm:$0xff] %v976_v6  ;;  %v1605_v40 = vadd.f32 %v1573_v14, %v1459_v19  ;;  %v836_v16 = vadd.f32 %v835_v10, %v592_v33  ;;  %v1462_v29 = vpop.f32.mrb[72].mxu0  ;;  %v837_v57 = vpop.f32.mrb[73].mxu1  ;;  %v1375_v32 = vadd.f32 %v2480_v34, %v2502_v45  ;;  %v752_v23 = vadd.f32 %v2482_v35, %v2510_v49 }
 0x256   :  { %1753 = vst [vmem:[%s3106_s6 + $0x130] sm:$0xff] %v1604_v55  ;;  %1009 = vst [vmem:[%s3106_s6 + $0x38] sm:$0xff] %v977_v1  ;;  %v1463_v30 = vadd.f32 %v1462_v29, %v592_v33  ;;  %v838_v4 = vadd.f32 %v837_v57, %v592_v33  ;;  %v1464_v60 = vpop.f32.mrb[73].mxu0  ;;  %v1379_v38 = vadd.f32 %v2484_v36, %v2510_v49  ;;  %v602_v19 = vpop.permute.xlu0 %601 }
 0x257   :  { %1754 = vst [vmem:[%s3106_s6 + $0x138] sm:$0xff] %v1605_v40  ;;  %v978_v0 = vadd.f32 %v946_v51, %v836_v16  ;;  %v1465_v8 = vadd.f32 %v1464_v60, %v592_v33  ;;  %v948_v45 = vmul.f32 %v916_v17, %v746_v28  ;;  %v754_v26 = vadd.f32 %v2486_v37, %v2510_v49  ;;  %v920_v16 = vld [vmem:[%s3105_s0 + $0x70] sm:$0xff] }
 0x258   :  { %v1606_v59 = vadd.f32 %v1574_v53, %v1463_v30  ;;  %v979_v52 = vadd.f32 %v947_v20, %v838_v4  ;;  %v841_v34 = vpop.f32.mrb[74].mxu1  ;;  %v1576_v3 = vmul.f32 %v1725_v58, %v1373_v21  ;;  %v949_v63 = vmul.f32 %v917_v31, %v748_v22  ;;  %v1728_v53 = vld [vmem:[%s3105_s0 + $0x168] sm:$0xff]  ;;  %v1729_v30 = vld [vmem:[%s3105_s0 + $0x170] sm:$0xff]  ;;  %v1730_v58 = vld [vmem:[%s3105_s0 + $0x178] sm:$0xff] }
 0x259   :  { %1010 = vst [vmem:[%s3106_s6 + $0x40] sm:$0xff] %v978_v0  ;;  %v1607_v35 = vadd.f32 %v1575_v2, %v1465_v8  ;;  %v842_v36 = vadd.f32 %v841_v34, %v597_v18  ;;  %v1468_v24 = vpop.f32.mrb[74].mxu0  ;;  %v843_v62 = vpop.f32.mrb[75].mxu1  ;;  %v1577_v9 = vmul.f32 %v1726_v11, %v1375_v32  ;;  %v1381_v14 = vadd.f32 %v2490_v39, %v2510_v49  ;;  %v1731_v11 = vld [vmem:[%s3105_s0 + $0x180] sm:$0xff] }
 0x25a   :  { %1755 = vst [vmem:[%s3106_s6 + $0x140] sm:$0xff] %v1606_v59  ;;  %1011 = vst [vmem:[%s3106_s6 + $0x48] sm:$0xff] %v979_v52  ;;  %v1469_v37 = vadd.f32 %v1468_v24, %v597_v18  ;;  %v844_v27 = vadd.f32 %v843_v62, %v597_v18  ;;  %v1470_v5 = vpop.f32.mrb[75].mxu0  ;;  %v950_v33 = vmul.f32 %v918_v12, %v752_v23  ;;  %v607_v2 = vpop.permute.xlu1 %606 }
 0x25b   :  { %1756 = vst [vmem:[%s3106_s6 + $0x148] sm:$0xff] %v1607_v35  ;;  %v980_v7 = vadd.f32 %v948_v45, %v842_v36  ;;  %v1471_v6 = vadd.f32 %v1470_v5, %v597_v18  ;;  %v1578_v51 = vmul.f32 %v1727_v25, %v1379_v38  ;;  %v951_v10 = vmul.f32 %v919_v13, %v754_v26  ;;  %v922_v18 = vld [vmem:[%s3105_s0 + $0x80] sm:$0xff]  ;;  %v923_v45 = vld [vmem:[%s3105_s0 + $0x88] sm:$0xff]  ;;  %v612_v62 = vpop.permute.xlu0 %611 }
 0x25c   :  { %v1608_v15 = vadd.f32 %v1576_v3, %v1469_v37  ;;  %v981_v55 = vadd.f32 %v949_v63, %v844_v27  ;;  %v847_v1 = vpop.f32.mrb[76].mxu1  ;;  %v758_v39 = vadd.f32 %v2494_v41, %v2520_v54  ;;  %v1385_v29 = vadd.f32 %v2496_v42, %v2520_v54  ;;  %v921_v42 = vld [vmem:[%s3105_s0 + $0x78] sm:$0xff]  ;;  %v1732_v13 = vld [vmem:[%s3105_s0 + $0x188] sm:$0xff] }
 0x25d   :  { %1012 = vst [vmem:[%s3106_s6 + $0x50] sm:$0xff] %v980_v7  ;;  %v1609_v49 = vadd.f32 %v1577_v9, %v1471_v6  ;;  %v848_v20 = vadd.f32 %v847_v1, %v602_v19  ;;  %v1474_v28 = vpop.f32.mrb[76].mxu0  ;;  %v849_v40 = vpop.f32.mrb[77].mxu1  ;;  %v760_v57 = vadd.f32 %v2498_v43, %v2520_v54  ;;  %v1579_v22 = vmul.f32 %v1728_v53, %v1381_v14  ;;  %v3147_v14 = vld [vmem:[#allocation2_spill] sm:$0xff] }
 0x25e   :  { %1757 = vst [vmem:[%s3106_s6 + $0x150] sm:$0xff] %v1608_v15  ;;  %1013 = vst [vmem:[%s3106_s6 + $0x58] sm:$0xff] %v981_v55  ;;  %v1475_v41 = vadd.f32 %v1474_v28, %v602_v19  ;;  %v850_v17 = vadd.f32 %v849_v40, %v602_v19  ;;  %v1476_v21 = vpop.f32.mrb[77].mxu0  ;;  %v1387_v43 = vadd.f32 %v2500_v44, %v2520_v54  ;;  %v3149_v15 = vld [vmem:[#allocation4_spill] sm:$0xff]  ;;  %v925_v28 = vld [vmem:[%s3105_s0 + $0x98] sm:$0xff] }
 0x25f   :  { %1758 = vst [vmem:[%s3106_s6 + $0x158] sm:$0xff] %v1609_v49  ;;  %v982_v4 = vadd.f32 %v950_v33, %v848_v20  ;;  %v1477_v60 = vadd.f32 %v1476_v21, %v602_v19  ;;  %v764_v31 = vadd.f32 %v2504_v46, %v2524_v56  ;;  %v1391_v32 = vadd.f32 %v2506_v47, %v2524_v56  ;;  %v924_v33 = vld [vmem:[%s3105_s0 + $0x90] sm:$0xff]  ;;  %v3150_v40 = vld [vmem:[#allocation5_spill] sm:$0xff] }
 0x260   :  { %v1610_v0 = vadd.f32 %v1578_v51, %v1475_v41  ;;  %v983_v8 = vadd.f32 %v951_v10, %v850_v17  ;;  %v853_v44 = vpop.f32.mrb[78].mxu1  ;;  %v952_v54 = vmul.f32 %v920_v16, %v758_v39  ;;  %v766_v23 = vadd.f32 %v2508_v48, %v2524_v56  ;;  %v3148_v51 = vld [vmem:[#allocation3_spill] sm:$0xff]  ;;  %v1733_v20 = vld [vmem:[%s3105_s0 + $0x190] sm:$0xff]  ;;  %v617_v41 = vpop.permute.xlu1 %616  ;;  %v1734_v17 = vld [vmem:[%s3105_s0 + $0x198] sm:$0xff] }
 0x261   :  { %1014 = vst [vmem:[%s3106_s6 + $0x60] sm:$0xff] %v982_v4  ;;  %v1611_v46 = vadd.f32 %v1579_v22, %v1477_v60  ;;  %v854_v47 = vadd.f32 %v853_v44, %v607_v2  ;;  %v1480_v38 = vpop.f32.mrb[78].mxu0  ;;  %v855_v59 = vpop.f32.mrb[79].mxu1  ;;  %v1580_v52 = vmul.f32 %v1729_v30, %v1385_v29  ;;  %v953_v34 = vmul.f32 %v921_v42, %v760_v57  ;;  %v3151_v21 = vld [vmem:[#allocation13_spill] sm:$0xff]  ;;  %v3152_v22 = vld [vmem:[#allocation6_spill] sm:$0xff]  ;;  %v3153_v42 = vld [vmem:[#allocation7_spill] sm:$0xff] }
 0x262   :  { %1759 = vst [vmem:[%s3106_s6 + $0x160] sm:$0xff] %v1610_v0  ;;  %1015 = vst [vmem:[%s3106_s6 + $0x68] sm:$0xff] %v983_v8  ;;  %v1481_v48 = vadd.f32 %v1480_v38, %v607_v2  ;;  %v856_v12 = vadd.f32 %v855_v59, %v607_v2  ;;  %v1482_v25 = vpop.f32.mrb[79].mxu0  ;;  %v1581_v26 = vmul.f32 %v1730_v58, %v1387_v43  ;;  %v926_v58 = vld [vmem:[%s3105_s0 + $0xa0] sm:$0xff] }
 0x263   :  { %v1393_v35 = vadd.f32 %v2512_v50, %v2524_v56  ;;  %1760 = vst [vmem:[%s3106_s6 + $0x168] sm:$0xff] %v1611_v46  ;;  %v984_v36 = vadd.f32 %v952_v54, %v854_v47  ;;  %v1483_v24 = vadd.f32 %v1482_v25, %v607_v2  ;;  %v954_v3 = vmul.f32 %v922_v18, %v764_v31  ;;  %v1735_v31 = vld [vmem:[%s3105_s0 + $0x1a0] sm:$0xff]  ;;  %v927_v46 = vld [vmem:[%s3105_s0 + $0xa8] sm:$0xff]  ;;  %v622_v25 = vpop.permute.xlu0 %621 }
 0x264   :  { %v1582_v63 = vmul.f32 %v1731_v11, %v1391_v32  ;;  %v1612_v37 = vadd.f32 %v1580_v52, %v1481_v48  ;;  %v985_v27 = vadd.f32 %v953_v34, %v856_v12  ;;  %v859_v5 = vpop.f32.mrb[80].mxu1  ;;  %v955_v9 = vmul.f32 %v923_v45, %v766_v23  ;;  %v3154_v32 = vld [vmem:[#allocation8_spill] sm:$0xff]  ;;  %v3155_v34 = vld [vmem:[#allocation9_spill] sm:$0xff] }
 0x265   :  { %v770_v50 = vadd.f32 %v3147_v14, %v2534_v61  ;;  %1016 = vst [vmem:[%s3106_s6 + $0x70] sm:$0xff] %v984_v36  ;;  %v1613_v56 = vadd.f32 %v1581_v26, %v1483_v24  ;;  %v860_v7 = vadd.f32 %v859_v5, %v612_v62  ;;  %v1486_v6 = vpop.f32.mrb[80].mxu0  ;;  %v861_v19 = vpop.f32.mrb[81].mxu1  ;;  %v1397_v53 = vadd.f32 %v3148_v51, %v2534_v61  ;;  %v1736_v36 = vld [vmem:[%s3105_s0 + $0x1a8] sm:$0xff] }
 0x266   :  { %v772_v55 = vadd.f32 %v3149_v15, %v2534_v61  ;;  %1761 = vst [vmem:[%s3106_s6 + $0x170] sm:$0xff] %v1612_v37  ;;  %1017 = vst [vmem:[%s3106_s6 + $0x78] sm:$0xff] %v985_v27  ;;  %v1487_v1 = vadd.f32 %v1486_v6, %v612_v62  ;;  %v862_v10 = vadd.f32 %v861_v19, %v612_v62  ;;  %v1488_v39 = vpop.f32.mrb[81].mxu0  ;;  %v3157_v37 = vld [vmem:[#allocation10_spill] sm:$0xff]  ;;  %v3159_v19 = vld [vmem:[#allocation12_spill] sm:$0xff] }
 0x267   :  { %v1583_v49 = vmul.f32 %v1732_v13, %v1393_v35  ;;  %v1399_v16 = vadd.f32 %v3150_v40, %v2534_v61  ;;  %1762 = vst [vmem:[%s3106_s6 + $0x178] sm:$0xff] %v1613_v56  ;;  %v986_v29 = vadd.f32 %v954_v3, %v860_v7  ;;  %v1489_v57 = vadd.f32 %v1488_v39, %v612_v62  ;;  %v3156_v13 = vld [vmem:[#allocation18_spill] sm:$0xff]  ;;  %v928_v56 = vld [vmem:[%s3105_s0 + $0xb0] sm:$0xff]  ;;  %v3158_v7 = vld [vmem:[#allocation11_spill] sm:$0xff]  ;;  %v627_v40 = vpop.permute.xlu1 %626 }
 0x268   :  { %v776_v30 = vadd.f32 %v3152_v22, %v3151_v21  ;;  %v1403_v43 = vadd.f32 %v3153_v42, %v3151_v21  ;;  %v1614_v4 = vadd.f32 %v1582_v63, %v1487_v1  ;;  %v987_v60 = vadd.f32 %v955_v9, %v862_v10  ;;  %v865_v61 = vpop.f32.mrb[82].mxu1  ;;  %v1737_v1 = vld [vmem:[%s3105_s0 + $0x1b0] sm:$0xff]  ;;  %v929_v10 = vld [vmem:[%s3105_s0 + $0xb8] sm:$0xff]  ;;  %v3160_v39 = vld [vmem:[#allocation14_spill] sm:$0xff] }
 0x269   :  { %v956_v2 = vmul.f32 %v924_v33, %v770_v50  ;;  %v778_v0 = vadd.f32 %v3154_v32, %v3151_v21  ;;  %1018 = vst [vmem:[%s3106_s6 + $0x80] sm:$0xff] %v986_v29  ;;  %v1615_v8 = vadd.f32 %v1583_v49, %v1489_v57  ;;  %v866_v44 = vadd.f32 %v865_v61, %v617_v41  ;;  %v1492_v54 = vpop.f32.mrb[82].mxu0  ;;  %v867_v18 = vpop.f32.mrb[83].mxu1  ;;  %v3161_v29 = vld [vmem:[#allocation20_spill] sm:$0xff]  ;;  %v3162_v57 = vld [vmem:[#allocation15_spill] sm:$0xff]  ;;  %v3164_v61 = vld [vmem:[#allocation17_spill] sm:$0xff] }
 0x26a   :  { %v1584_v11 = vmul.f32 %v1733_v20, %v1397_v53  ;;  %v957_v23 = vmul.f32 %v925_v28, %v772_v55  ;;  %1763 = vst [vmem:[%s3106_s6 + $0x180] sm:$0xff] %v1614_v4  ;;  %1019 = vst [vmem:[%s3106_s6 + $0x88] sm:$0xff] %v987_v60  ;;  %v1493_v47 = vadd.f32 %v1492_v54, %v617_v41  ;;  %v1494_v59 = vpop.f32.mrb[83].mxu0  ;;  %v930_v4 = vld [vmem:[%s3105_s0 + $0xc0] sm:$0xff]  ;;  %v931_v54 = vld [vmem:[%s3105_s0 + $0xc8] sm:$0xff] }
 0x26b   :  { %v868_v38 = vadd.f32 %v867_v18, %v617_v41  ;;  %v1585_v52 = vmul.f32 %v1734_v17, %v1399_v16  ;;  %v1405_v45 = vadd.f32 %v3155_v34, %v3151_v21  ;;  %1764 = vst [vmem:[%s3106_s6 + $0x188] sm:$0xff] %v1615_v8  ;;  %v988_v48 = vadd.f32 %v956_v2, %v866_v44  ;;  %v1738_v16 = vld [vmem:[%s3105_s0 + $0x1b8] sm:$0xff]  ;;  %v3163_v17 = vld [vmem:[#allocation16_spill] sm:$0xff]  ;;  %v1739_v60 = vld [vmem:[%s3105_s0 + $0x1c0] sm:$0xff]  ;;  %v632_v34 = vpop.permute.xlu0 %631 }
 0x26c   :  { %v1495_v12 = vadd.f32 %v1494_v59, %v617_v41  ;;  %v958_v26 = vmul.f32 %v926_v58, %v776_v30  ;;  %v1586_v35 = vmul.f32 %v1735_v31, %v1403_v43  ;;  %v1616_v24 = vadd.f32 %v1584_v11, %v1493_v47  ;;  %v871_v3 = vpop.f32.mrb[84].mxu1  ;;  %v3165_v47 = vld [vmem:[#allocation19_spill] sm:$0xff] }
 0x26d   :  { %v989_v62 = vadd.f32 %v957_v23, %v868_v38  ;;  %v959_v63 = vmul.f32 %v927_v46, %v778_v0  ;;  %v782_v27 = vadd.f32 %v3157_v37, %v3156_v13  ;;  %1020 = vst [vmem:[%s3106_s6 + $0x90] sm:$0xff] %v988_v48  ;;  %v872_v9 = vadd.f32 %v871_v3, %v622_v25  ;;  %v1498_v14 = vpop.f32.mrb[84].mxu0  ;;  %v873_v50 = vpop.f32.mrb[85].mxu1 }
 0x26e   :  { %v1617_v5 = vadd.f32 %v1585_v52, %v1495_v12  ;;  %v1409_v6 = vadd.f32 %v3158_v7, %v3156_v13  ;;  %v784_v33 = vadd.f32 %v3159_v19, %v3156_v13  ;;  %1765 = vst [vmem:[%s3106_s6 + $0x190] sm:$0xff] %v1616_v24  ;;  %v1499_v51 = vadd.f32 %v1498_v14, %v622_v25  ;;  %v1500_v15 = vpop.f32.mrb[85].mxu0  ;;  %v1740_v12 = vld [vmem:[%s3105_s0 + $0x1c8] sm:$0xff]  ;;  %v3166_v24 = vld [vmem:[#allocation25_spill] sm:$0xff] }
 0x26f   :  { %1021 = vst [vmem:[%s3106_s6 + $0x98] sm:$0xff] %v989_v62  ;;  %v874_v53 = vadd.f32 %v873_v50, %v622_v25  ;;  %v1587_v55 = vmul.f32 %v1736_v36, %v1405_v45  ;;  %v1411_v49 = vadd.f32 %v3160_v39, %v3156_v13  ;;  %v990_v20 = vadd.f32 %v958_v26, %v872_v9  ;;  %v3167_v62 = vld [vmem:[#allocation21_spill] sm:$0xff]  ;;  %v3168_v9 = vld [vmem:[#allocation22_spill] sm:$0xff]  ;;  %v3169_v50 = vld [vmem:[#allocation23_spill] sm:$0xff]  ;;  %v637_v39 = vpop.permute.xlu1 %636 }
 0x270   :  { %1766 = vst [vmem:[%s3106_s6 + $0x198] sm:$0xff] %v1617_v5  ;;  %v1501_v28 = vadd.f32 %v1500_v15, %v622_v25  ;;  %v788_v41 = vadd.f32 %v3162_v57, %v3161_v29  ;;  %v1415_v21 = vadd.f32 %v3163_v17, %v3161_v29  ;;  %v1618_v22 = vadd.f32 %v1586_v35, %v1499_v51  ;;  %v877_v42 = vpop.f32.mrb[86].mxu1  ;;  %v932_v5 = vld [vmem:[%s3105_s0 + $0xd0] sm:$0xff] }
 0x271   :  { %v991_v30 = vadd.f32 %v959_v63, %v874_v53  ;;  %v960_v43 = vmul.f32 %v928_v56, %v782_v27  ;;  %v790_v2 = vadd.f32 %v3164_v61, %v3161_v29  ;;  %1022 = vst [vmem:[%s3106_s6 + $0xa0] sm:$0xff] %v990_v20  ;;  %v878_v31 = vadd.f32 %v877_v42, %v627_v40  ;;  %v1504_v32 = vpop.f32.mrb[86].mxu0  ;;  %v879_v0 = vpop.f32.mrb[87].mxu1  ;;  %v1741_v51 = vld [vmem:[%s3105_s0 + $0x1d0] sm:$0xff]  ;;  %v933_v53 = vld [vmem:[%s3105_s0 + $0xd8] sm:$0xff] }
 0x272   :  { %v1619_v58 = vadd.f32 %v1587_v55, %v1501_v28  ;;  %v1588_v8 = vmul.f32 %v1737_v1, %v1409_v6  ;;  %v961_v44 = vmul.f32 %v929_v10, %v784_v33  ;;  %1767 = vst [vmem:[%s3106_s6 + $0x1a0] sm:$0xff] %v1618_v22  ;;  %v1505_v18 = vadd.f32 %v1504_v32, %v627_v40  ;;  %v1506_v23 = vpop.f32.mrb[87].mxu0  ;;  %v3170_v15 = vld [vmem:[#allocation24_spill] sm:$0xff]  ;;  %v3171_v20 = vld [vmem:[#allocation29_spill] sm:$0xff]  ;;  %v3172_v28 = vld [vmem:[#allocation26_spill] sm:$0xff] }
 0x273   :  { %1023 = vst [vmem:[%s3106_s6 + $0xa8] sm:$0xff] %v991_v30  ;;  %v880_v11 = vadd.f32 %v879_v0, %v627_v40  ;;  %v1589_v46 = vmul.f32 %v1738_v16, %v1411_v49  ;;  %v1417_v38 = vadd.f32 %v3165_v47, %v3161_v29  ;;  %v992_v59 = vadd.f32 %v960_v43, %v878_v31  ;;  %v1742_v49 = vld [vmem:[%s3105_s0 + $0x1d8] sm:$0xff]  ;;  %v3173_v16 = vld [vmem:[#allocation27_spill] sm:$0xff]  ;;  %v934_v22 = vld [vmem:[%s3105_s0 + $0xe0] sm:$0xff]  ;;  %v642_v47 = vpop.permute.xlu0 %641 }
 0x274   :  { %1768 = vst [vmem:[%s3106_s6 + $0x1a8] sm:$0xff] %v1619_v58  ;;  %v1507_v52 = vadd.f32 %v1506_v23, %v627_v40  ;;  %v962_v45 = vmul.f32 %v930_v4, %v788_v41  ;;  %v1590_v48 = vmul.f32 %v1739_v60, %v1415_v21  ;;  %v1620_v25 = vadd.f32 %v1588_v8, %v1505_v18  ;;  %v883_v35 = vpop.f32.mrb[88].mxu1  ;;  %v1743_v30 = vld [vmem:[%s3105_s0 + $0x1e0] sm:$0xff]  ;;  %v3174_v42 = vld [vmem:[#allocation28_spill] sm:$0xff]  ;;  %v935_v32 = vld [vmem:[%s3105_s0 + $0xe8] sm:$0xff] }
 0x275   :  { %v993_v26 = vadd.f32 %v961_v44, %v880_v11  ;;  %v963_v36 = vmul.f32 %v931_v54, %v790_v2  ;;  %v794_v3 = vadd.f32 %v3167_v62, %v3166_v24  ;;  %1024 = vst [vmem:[%s3106_s6 + $0xb0] sm:$0xff] %v992_v59  ;;  %v884_v13 = vadd.f32 %v883_v35, %v632_v34  ;;  %v1510_v37 = vpop.f32.mrb[88].mxu0  ;;  %v885_v27 = vpop.f32.mrb[89].mxu1  ;;  %v3175_v18 = vld [vmem:[#allocation30_spill] sm:$0xff] }
 0x276   :  { %v1621_v63 = vadd.f32 %v1589_v46, %v1507_v52  ;;  %v1421_v14 = vadd.f32 %v3168_v9, %v3166_v24  ;;  %v796_v56 = vadd.f32 %v3169_v50, %v3166_v24  ;;  %1769 = vst [vmem:[%s3106_s6 + $0x1b0] sm:$0xff] %v1620_v25  ;;  %v1511_v7 = vadd.f32 %v1510_v37, %v632_v34  ;;  %v1512_v19 = vpop.f32.mrb[89].mxu0  ;;  %v1744_v52 = vld [vmem:[%s3105_s0 + $0x1e8] sm:$0xff]  ;;  %v3176_v25 = vld [vmem:[#allocation34_spill] sm:$0xff] }
 0x277   :  { %1025 = vst [vmem:[%s3106_s6 + $0xb8] sm:$0xff] %v993_v26  ;;  %v886_v6 = vadd.f32 %v885_v27, %v632_v34  ;;  %v1591_v33 = vmul.f32 %v1740_v12, %v1417_v38  ;;  %v1423_v55 = vadd.f32 %v3170_v15, %v3166_v24  ;;  %v994_v1 = vadd.f32 %v962_v45, %v884_v13  ;;  %v3177_v26 = vld [vmem:[#allocation31_spill] sm:$0xff]  ;;  %v3178_v13 = vld [vmem:[#allocation32_spill] sm:$0xff]  ;;  %v3179_v27 = vld [vmem:[#allocation33_spill] sm:$0xff]  ;;  %v647_v15 = vpop.permute.xlu1 %646 }
 0x278   :  { %1770 = vst [vmem:[%s3106_s6 + $0x1b8] sm:$0xff] %v1621_v63  ;;  %v1513_v10 = vadd.f32 %v1512_v19, %v632_v34  ;;  %v800_v40 = vadd.f32 %v3172_v28, %v3171_v20  ;;  %v1427_v29 = vadd.f32 %v3173_v16, %v3171_v20  ;;  %v1622_v57 = vadd.f32 %v1590_v48, %v1511_v7  ;;  %v889_v17 = vpop.f32.mrb[90].mxu1  ;;  %v936_v63 = vld [vmem:[%s3105_s0 + $0xf0] sm:$0xff]  ;;  %v3180_v19 = vld [vmem:[#allocation35_spill] sm:$0xff] }
 0x279   :  { %v995_v41 = vadd.f32 %v963_v36, %v886_v6  ;;  %v964_v21 = vmul.f32 %v932_v5, %v794_v3  ;;  %v802_v43 = vadd.f32 %v3174_v42, %v3171_v20  ;;  %1026 = vst [vmem:[%s3106_s6 + $0xc0] sm:$0xff] %v994_v1  ;;  %v890_v60 = vadd.f32 %v889_v17, %v637_v39  ;;  %v1516_v61 = vpop.f32.mrb[90].mxu0  ;;  %v891_v2 = vpop.f32.mrb[91].mxu1  ;;  %v1745_v7 = vld [vmem:[%s3105_s0 + $0x1f0] sm:$0xff]  ;;  %v937_v6 = vld [vmem:[%s3105_s0 + $0xf8] sm:$0xff] }
 0x27a   :  { %v1623_v4 = vadd.f32 %v1591_v33, %v1513_v10  ;;  %v1592_v58 = vmul.f32 %v1741_v51, %v1421_v14  ;;  %v965_v31 = vmul.f32 %v933_v53, %v796_v56  ;;  %1771 = vst [vmem:[%s3106_s6 + $0x1c0] sm:$0xff] %v1622_v57  ;;  %v1517_v0 = vadd.f32 %v1516_v61, %v637_v39  ;;  %v1518_v44 = vpop.f32.mrb[91].mxu0 }
 0x27b   :  { %1027 = vst [vmem:[%s3106_s6 + $0xc8] sm:$0xff] %v995_v41  ;;  %v892_v8 = vadd.f32 %v891_v2, %v637_v39  ;;  %v1593_v54 = vmul.f32 %v1742_v49, %v1423_v55  ;;  %v1429_v11 = vadd.f32 %v3175_v18, %v3171_v20  ;;  %v996_v23 = vadd.f32 %v964_v21, %v890_v60  ;;  %v1746_v55 = vld [vmem:[%s3105_s0 + $0x1f8] sm:$0xff] }
 0x27c   :  { %1772 = vst [vmem:[%s3106_s6 + $0x1c8] sm:$0xff] %v1623_v4  ;;  %v1519_v46 = vadd.f32 %v1518_v44, %v637_v39  ;;  %v966_v38 = vmul.f32 %v934_v22, %v800_v40  ;;  %v1594_v59 = vmul.f32 %v1743_v30, %v1427_v29  ;;  %v1624_v34 = vadd.f32 %v1592_v58, %v1517_v0  ;;  %v895_v48 = vpop.f32.mrb[92].mxu1 }
 0x27d   :  { %v997_v45 = vadd.f32 %v965_v31, %v892_v8  ;;  %v967_v12 = vmul.f32 %v935_v32, %v802_v43  ;;  %v806_v35 = vadd.f32 %v3177_v26, %v3176_v25  ;;  %1028 = vst [vmem:[%s3106_s6 + $0xd0] sm:$0xff] %v996_v23  ;;  %v896_v24 = vadd.f32 %v895_v48, %v642_v47  ;;  %v1522_v62 = vpop.f32.mrb[92].mxu0  ;;  %v897_v3 = vpop.f32.mrb[93].mxu1 }
 0x27e   :  { %v1625_v36 = vadd.f32 %v1593_v54, %v1519_v46  ;;  %v1433_v37 = vadd.f32 %v3178_v13, %v3176_v25  ;;  %v808_v5 = vadd.f32 %v3179_v27, %v3176_v25  ;;  %1773 = vst [vmem:[%s3106_s6 + $0x1d0] sm:$0xff] %v1624_v34  ;;  %v1523_v9 = vadd.f32 %v1522_v62, %v642_v47  ;;  %v1524_v50 = vpop.f32.mrb[93].mxu0 }
 0x27f   :  { %1029 = vst [vmem:[%s3106_s6 + $0xd8] sm:$0xff] %v997_v45  ;;  %v898_v14 = vadd.f32 %v897_v3, %v642_v47  ;;  %v1595_v56 = vmul.f32 %v1744_v52, %v1429_v11  ;;  %v1435_v33 = vadd.f32 %v3180_v19, %v3176_v25  ;;  %v998_v51 = vadd.f32 %v966_v38, %v896_v24 }
 0x280   :  { %1774 = vst [vmem:[%s3106_s6 + $0x1d8] sm:$0xff] %v1625_v36  ;;  %v1525_v53 = vadd.f32 %v1524_v50, %v642_v47  ;;  %v1626_v1 = vadd.f32 %v1594_v59, %v1523_v9  ;;  %v901_v39 = vpop.f32.mrb[94].mxu1  ;;  %v968_v49 = vmul.f32 %v936_v63, %v806_v35  ;;  %v1596_v29 = vmul.f32 %v1745_v7, %v1433_v37 }
 0x281   :  { %v999_v10 = vadd.f32 %v967_v12, %v898_v14  ;;  %1030 = vst [vmem:[%s3106_s6 + $0xe0] sm:$0xff] %v998_v51  ;;  %v902_v28 = vadd.f32 %v901_v39, %v647_v15  ;;  %v1528_v40 = vpop.f32.mrb[94].mxu0  ;;  %v903_v16 = vpop.f32.mrb[95].mxu1  ;;  %v969_v57 = vmul.f32 %v937_v6, %v808_v5  ;;  %v1597_v22 = vmul.f32 %v1746_v55, %v1435_v33 }
 0x282   :  { %v1627_v20 = vadd.f32 %v1595_v56, %v1525_v53  ;;  %1775 = vst [vmem:[%s3106_s6 + $0x1e0] sm:$0xff] %v1626_v1  ;;  %v1529_v41 = vadd.f32 %v1528_v40, %v647_v15  ;;  %v904_v17 = vadd.f32 %v903_v16, %v647_v15  ;;  %v1530_v21 = vpop.f32.mrb[95].mxu0 }
 0x283   :  { %1031 = vst [vmem:[%s3106_s6 + $0xe8] sm:$0xff] %v999_v10  ;;  %v1000_v30 = vadd.f32 %v968_v49, %v902_v28  ;;  %v1531_v42 = vadd.f32 %v1530_v21, %v647_v15 }
 0x284   :  { %1776 = vst [vmem:[%s3106_s6 + $0x1e8] sm:$0xff] %v1627_v20  ;;  %v1628_v43 = vadd.f32 %v1596_v29, %v1529_v41  ;;  %v1001_v4 = vadd.f32 %v969_v57, %v904_v17 }
 0x285   :  { %1032 = vst [vmem:[%s3106_s6 + $0xf0] sm:$0xff] %v1000_v30  ;;  %v1629_v60 = vadd.f32 %v1597_v22, %v1531_v42 }
 0x286   :  { %1777 = vst [vmem:[%s3106_s6 + $0x1f0] sm:$0xff] %v1628_v43  ;;  %1033 = vst [vmem:[%s3106_s6 + $0xf8] sm:$0xff] %v1001_v4 }
 0x287   :  { %1778 = vst [vmem:[%s3106_s6 + $0x1f8] sm:$0xff] %v1629_v60 }

</bundles_post_ra>
